<compile_context>
chip_gen: v7x
topology: tpu7x:2x2x1
jax: 0.10.0
libtpu: 0.0.40
codegen_flags: <defaults>
</compile_context>

<pallas_src>
import jax
import jax.numpy as jnp
from jax import lax
from jax.experimental import pallas as pl
from jax.experimental.pallas import tpu as pltpu

HIDDEN = 128   # hidden_size (lane-aligned; module default 256 also works)
VOCAB = 64     # input_size (vocabulary size) -- small demo vocab
SEQ_LEN = 8    # number of encoder steps folded into one kernel call


def encoder_seq_kernel(tokens_ref, emb_ref, wih_ref, whh_ref, bih_ref, bhh_ref,
                       h0_ref, out_seq_ref, h_last_ref, x_scr, gi_scr):
    T, H = out_seq_ref.shape
    V = emb_ref.shape[0]

    # ---- Phase 1: embedding gather for all timesteps (token ids clamped). ----
    # TODO(synk): for real vocabularies keep `emb` in HBM (memory_space=pl.ANY)
    # and make_async_copy only the needed rows instead of a VMEM-resident table.
    def gather_body(t, carry):
        tok = jnp.clip(tokens_ref[t], 0, V - 1)
        x_scr[pl.ds(t, 1), :] = emb_ref[pl.ds(tok, 1), :]
        return carry

    lax.fori_loop(0, T, gather_body, 0, unroll=True)

    # ---- Hoisted input projection: one batched (T,H) @ (H,3H) MXU matmul. ----
    gi_scr[...] = (
        jnp.dot(x_scr[...].astype(jnp.bfloat16), wih_ref[...],
                preferred_element_type=jnp.float32)
        + bih_ref[...]
    )

    # ---- Phase 2: serial GRU recurrence (PyTorch gate order r, z, n). ----
    def step(t, h):
        gi = gi_scr[pl.ds(t, 1), :]                                   # (1, 3H)
        gh = (jnp.dot(h.astype(jnp.bfloat16), whh_ref[...],
                      preferred_element_type=jnp.float32)
              + bhh_ref[...])                                          # (1, 3H)
        r = jax.nn.sigmoid(gi[:, 0:H] + gh[:, 0:H])
        z = jax.nn.sigmoid(gi[:, H:2 * H] + gh[:, H:2 * H])
        n = jnp.tanh(gi[:, 2 * H:3 * H] + r * gh[:, 2 * H:3 * H])
        h_new = (1.0 - z) * n + z * h
        out_seq_ref[pl.ds(t, 1), :] = h_new
        return h_new

    h_last = lax.fori_loop(0, T, step, h0_ref[...], unroll=True)
    h_last_ref[...] = h_last


def encoder_rnn_forward(tokens, hidden, params):
    """tokens: int32 (T,); hidden: (1, 1, H) float32.
    Returns (outputs (T, 1, H), hidden (1, 1, H)) — identical to running the
    PyTorch EncoderRNN.forward once per token while threading the hidden."""
    emb, w_ih_t, w_hh_t, b_ih, b_hh = params
    T = tokens.shape[0]
    H = emb.shape[1]

    vmem = pl.BlockSpec(memory_space=pltpu.MemorySpace.VMEM)
    smem = pl.BlockSpec(memory_space=pltpu.MemorySpace.SMEM)

    out_seq, h_last = pl.pallas_call(
        encoder_seq_kernel,
        out_shape=(jax.ShapeDtypeStruct((T, H), jnp.float32),
                   jax.ShapeDtypeStruct((1, H), jnp.float32)),
        in_specs=[smem, vmem, vmem, vmem, vmem, vmem, vmem],
        out_specs=(vmem, vmem),
        scratch_shapes=[pltpu.VMEM((T, H), jnp.float32),        # gathered emb
                        pltpu.VMEM((T, 3 * H), jnp.float32)],   # hoisted gi
        # Explicit VMEM budget: well under v7x's 64 MiB physical / 32 MiB
        # default scoped, and within v5e/v6e limits.
        compiler_params=pltpu.CompilerParams(
            vmem_limit_bytes=32 * 1024 * 1024),
    )(tokens.astype(jnp.int32),
      emb,
      w_ih_t,
      w_hh_t,
      b_ih.reshape(1, 3 * H),
      b_hh.reshape(1, 3 * H),
      hidden.reshape(1, H).astype(jnp.float32))

    return out_seq.reshape(T, 1, H), h_last.reshape(1, 1, H)


def ref_forward(tokens, hidden, params):
    """Pure-JAX reference mirroring the kernel numerics (bf16 weights/LHS,
    f32 accumulation and gate math), equivalent to the PyTorch module loop."""
    emb, w_ih_t, w_hh_t, b_ih, b_hh = params
    V, H = emb.shape
    h = hidden.reshape(1, H)
    outs = []
    for t in range(tokens.shape[0]):
        tok = jnp.clip(tokens[t], 0, V - 1)
        x = emb[tok][None, :]
        gi = jnp.dot(x.astype(jnp.bfloat16), w_ih_t,
                     preferred_element_type=jnp.float32) + b_ih[None, :]
        gh = jnp.dot(h.astype(jnp.bfloat16), w_hh_t,
                     preferred_element_type=jnp.float32) + b_hh[None, :]
        r = jax.nn.sigmoid(gi[:, 0:H] + gh[:, 0:H])
        z = jax.nn.sigmoid(gi[:, H:2 * H] + gh[:, H:2 * H])
        n = jnp.tanh(gi[:, 2 * H:3 * H] + r * gh[:, 2 * H:3 * H])
        h = (1.0 - z) * n + z * h
        outs.append(h)
    return jnp.stack(outs).reshape(-1, 1, H), h.reshape(1, 1, H)


def init_params(key, vocab, hidden):
    """Shapes match the PyTorch module:
    nn.Embedding(vocab, hidden): weight (vocab, hidden) ~ N(0,1), kept f32.
    nn.GRU(hidden, hidden): weight_ih/hh (3H, H), bias_ih/hh (3H,) ~ U(-k, k);
    weights pre-transposed to (H, 3H) and cast to bf16 for the kernel."""
    k = 1.0 / jnp.sqrt(hidden)
    k_emb, k_ih, k_hh, k_bi, k_bh = jax.random.split(key, 5)
    emb = jax.random.normal(k_emb, (vocab, hidden), jnp.float32)
    w_ih = jax.random.uniform(k_ih, (3 * hidden, hidden), jnp.float32, -k, k)
    w_hh = jax.random.uniform(k_hh, (3 * hidden, hidden), jnp.float32, -k, k)
    b_ih = jax.random.uniform(k_bi, (3 * hidden,), jnp.float32, -k, k)
    b_hh = jax.random.uniform(k_bh, (3 * hidden,), jnp.float32, -k, k)
    return (emb,
            w_ih.T.astype(jnp.bfloat16),
            w_hh.T.astype(jnp.bfloat16),
            b_ih, b_hh)


if __name__ == "__main__":
    key = jax.random.PRNGKey(0)
    params = init_params(key, VOCAB, HIDDEN)

    tokens = jax.random.randint(jax.random.PRNGKey(1), (SEQ_LEN,), 0, VOCAB,
                                dtype=jnp.int32)
    hidden0 = jnp.zeros((1, 1, HIDDEN), jnp.float32)      # initHidden()

    # Full-sequence encoder pass (T steps in one kernel call).
    out, hid = encoder_rnn_forward(tokens, hidden0, params)
    out = jax.block_until_ready(out)
    hid = jax.block_until_ready(hid)

    out_ref, hid_ref = ref_forward(tokens, hidden0, params)
    assert out.shape == (SEQ_LEN, 1, HIDDEN) and hid.shape == (1, 1, HIDDEN)
    assert jnp.allclose(out, out_ref, atol=1e-2), "sequence output mismatch"
    assert jnp.allclose(hid, hid_ref, atol=1e-2), "final hidden mismatch"

    # Single-step call (T=1) == one PyTorch EncoderRNN.forward invocation.
    tok1 = tokens[:1]
    out1, hid1 = encoder_rnn_forward(tok1, hidden0, params)
    out1 = jax.block_until_ready(out1)
    out1_ref, hid1_ref = ref_forward(tok1, hidden0, params)
    assert jnp.allclose(out1, out1_ref, atol=1e-2), "single-step output mismatch"
    assert jnp.allclose(hid1, hid1_ref, atol=1e-2), "single-step hidden mismatch"

    print("KERNEL_OK")
</pallas_src>

<mosaic_0001>
module attributes {stable_mosaic.version = 11 : i64} {
  func.func @encoder_seq_kernel(%arg0: memref<8xi32, #tpu.memory_space<smem>>, %arg1: memref<64x128xf32, #tpu.memory_space<vmem>>, %arg2: memref<128x384xbf16, #tpu.memory_space<vmem>>, %arg3: memref<128x384xbf16, #tpu.memory_space<vmem>>, %arg4: memref<1x384xf32, #tpu.memory_space<vmem>>, %arg5: memref<1x384xf32, #tpu.memory_space<vmem>>, %arg6: memref<1x128xf32, #tpu.memory_space<vmem>>, %arg7: memref<8x128xf32, #tpu.memory_space<vmem>>, %arg8: memref<1x128xf32, #tpu.memory_space<vmem>>, %arg9: memref<8x128xf32, #tpu.memory_space<vmem>>, %arg10: memref<8x384xf32, #tpu.memory_space<vmem>>) attributes {dimension_semantics = [], scalar_prefetch = 0 : i64, scratch_operands = 2 : i64, tpu.core_type = #tpu.core_type<tc>} {
    %c0_i32 = arith.constant 0 : i32
    %0 = arith.index_cast %c0_i32 : i32 to index
    %1 = memref.load %arg0[%0] : memref<8xi32, #tpu.memory_space<smem>>
    %c0_i32_0 = arith.constant 0 : i32
    %c63_i32 = arith.constant 63 : i32
    %2 = arith.maxsi %c0_i32_0, %1 : i32
    %3 = arith.minsi %c63_i32, %2 : i32
    %4 = arith.index_cast %3 : i32 to index
    %c0 = arith.constant 0 : index
    %5 = vector.load %arg1[%4, %c0] : memref<64x128xf32, #tpu.memory_space<vmem>>, vector<1x128xf32>
    %6 = arith.index_cast %c0_i32 : i32 to index
    %c0_1 = arith.constant 0 : index
    %7 = vector.load %arg9[%6, %c0_1] : memref<8x128xf32, #tpu.memory_space<vmem>>, vector<1x128xf32>
    tpu.vector_store %arg9[%6, %c0_1], %5 {strides = array<i32>} : memref<8x128xf32, #tpu.memory_space<vmem>>, vector<1x128xf32>,
    %c1_i32 = arith.constant 1 : i32
    %8 = arith.index_cast %c1_i32 : i32 to index
    %9 = memref.load %arg0[%8] : memref<8xi32, #tpu.memory_space<smem>>
    %c0_i32_2 = arith.constant 0 : i32
    %c63_i32_3 = arith.constant 63 : i32
    %10 = arith.maxsi %c0_i32_2, %9 : i32
    %11 = arith.minsi %c63_i32_3, %10 : i32
    %12 = arith.index_cast %11 : i32 to index
    %c0_4 = arith.constant 0 : index
    %13 = vector.load %arg1[%12, %c0_4] : memref<64x128xf32, #tpu.memory_space<vmem>>, vector<1x128xf32>
    %14 = arith.index_cast %c1_i32 : i32 to index
    %c0_5 = arith.constant 0 : index
    %15 = vector.load %arg9[%14, %c0_5] : memref<8x128xf32, #tpu.memory_space<vmem>>, vector<1x128xf32>
    tpu.vector_store %arg9[%14, %c0_5], %13 {strides = array<i32>} : memref<8x128xf32, #tpu.memory_space<vmem>>, vector<1x128xf32>,
    %c2_i32 = arith.constant 2 : i32
    %16 = arith.index_cast %c2_i32 : i32 to index
    %17 = memref.load %arg0[%16] : memref<8xi32, #tpu.memory_space<smem>>
    %c0_i32_6 = arith.constant 0 : i32
    %c63_i32_7 = arith.constant 63 : i32
    %18 = arith.maxsi %c0_i32_6, %17 : i32
    %19 = arith.minsi %c63_i32_7, %18 : i32
    %20 = arith.index_cast %19 : i32 to index
    %c0_8 = arith.constant 0 : index
    %21 = vector.load %arg1[%20, %c0_8] : memref<64x128xf32, #tpu.memory_space<vmem>>, vector<1x128xf32>
    %22 = arith.index_cast %c2_i32 : i32 to index
    %c0_9 = arith.constant 0 : index
    %23 = vector.load %arg9[%22, %c0_9] : memref<8x128xf32, #tpu.memory_space<vmem>>, vector<1x128xf32>
    tpu.vector_store %arg9[%22, %c0_9], %21 {strides = array<i32>} : memref<8x128xf32, #tpu.memory_space<vmem>>, vector<1x128xf32>,
    %c3_i32 = arith.constant 3 : i32
    %24 = arith.index_cast %c3_i32 : i32 to index
    %25 = memref.load %arg0[%24] : memref<8xi32, #tpu.memory_space<smem>>
    %c0_i32_10 = arith.constant 0 : i32
    %c63_i32_11 = arith.constant 63 : i32
    %26 = arith.maxsi %c0_i32_10, %25 : i32
    %27 = arith.minsi %c63_i32_11, %26 : i32
    %28 = arith.index_cast %27 : i32 to index
    %c0_12 = arith.constant 0 : index
    %29 = vector.load %arg1[%28, %c0_12] : memref<64x128xf32, #tpu.memory_space<vmem>>, vector<1x128xf32>
    %30 = arith.index_cast %c3_i32 : i32 to index
    %c0_13 = arith.constant 0 : index
    %31 = vector.load %arg9[%30, %c0_13] : memref<8x128xf32, #tpu.memory_space<vmem>>, vector<1x128xf32>
    tpu.vector_store %arg9[%30, %c0_13], %29 {strides = array<i32>} : memref<8x128xf32, #tpu.memory_space<vmem>>, vector<1x128xf32>,
    %c4_i32 = arith.constant 4 : i32
    %32 = arith.index_cast %c4_i32 : i32 to index
    %33 = memref.load %arg0[%32] : memref<8xi32, #tpu.memory_space<smem>>
    %c0_i32_14 = arith.constant 0 : i32
    %c63_i32_15 = arith.constant 63 : i32
    %34 = arith.maxsi %c0_i32_14, %33 : i32
    %35 = arith.minsi %c63_i32_15, %34 : i32
    %36 = arith.index_cast %35 : i32 to index
    %c0_16 = arith.constant 0 : index
    %37 = vector.load %arg1[%36, %c0_16] : memref<64x128xf32, #tpu.memory_space<vmem>>, vector<1x128xf32>
    %38 = arith.index_cast %c4_i32 : i32 to index
    %c0_17 = arith.constant 0 : index
    %39 = vector.load %arg9[%38, %c0_17] : memref<8x128xf32, #tpu.memory_space<vmem>>, vector<1x128xf32>
    tpu.vector_store %arg9[%38, %c0_17], %37 {strides = array<i32>} : memref<8x128xf32, #tpu.memory_space<vmem>>, vector<1x128xf32>,
    %c5_i32 = arith.constant 5 : i32
    %40 = arith.index_cast %c5_i32 : i32 to index
    %41 = memref.load %arg0[%40] : memref<8xi32, #tpu.memory_space<smem>>
    %c0_i32_18 = arith.constant 0 : i32
    %c63_i32_19 = arith.constant 63 : i32
    %42 = arith.maxsi %c0_i32_18, %41 : i32
    %43 = arith.minsi %c63_i32_19, %42 : i32
    %44 = arith.index_cast %43 : i32 to index
    %c0_20 = arith.constant 0 : index
    %45 = vector.load %arg1[%44, %c0_20] : memref<64x128xf32, #tpu.memory_space<vmem>>, vector<1x128xf32>
    %46 = arith.index_cast %c5_i32 : i32 to index
    %c0_21 = arith.constant 0 : index
    %47 = vector.load %arg9[%46, %c0_21] : memref<8x128xf32, #tpu.memory_space<vmem>>, vector<1x128xf32>
    tpu.vector_store %arg9[%46, %c0_21], %45 {strides = array<i32>} : memref<8x128xf32, #tpu.memory_space<vmem>>, vector<1x128xf32>,
    %c6_i32 = arith.constant 6 : i32
    %48 = arith.index_cast %c6_i32 : i32 to index
    %49 = memref.load %arg0[%48] : memref<8xi32, #tpu.memory_space<smem>>
    %c0_i32_22 = arith.constant 0 : i32
    %c63_i32_23 = arith.constant 63 : i32
    %50 = arith.maxsi %c0_i32_22, %49 : i32
    %51 = arith.minsi %c63_i32_23, %50 : i32
    %52 = arith.index_cast %51 : i32 to index
    %c0_24 = arith.constant 0 : index
    %53 = vector.load %arg1[%52, %c0_24] : memref<64x128xf32, #tpu.memory_space<vmem>>, vector<1x128xf32>
    %54 = arith.index_cast %c6_i32 : i32 to index
    %c0_25 = arith.constant 0 : index
    %55 = vector.load %arg9[%54, %c0_25] : memref<8x128xf32, #tpu.memory_space<vmem>>, vector<1x128xf32>
    tpu.vector_store %arg9[%54, %c0_25], %53 {strides = array<i32>} : memref<8x128xf32, #tpu.memory_space<vmem>>, vector<1x128xf32>,
    %c7_i32 = arith.constant 7 : i32
    %56 = arith.index_cast %c7_i32 : i32 to index
    %57 = memref.load %arg0[%56] : memref<8xi32, #tpu.memory_space<smem>>
    %c0_i32_26 = arith.constant 0 : i32
    %c63_i32_27 = arith.constant 63 : i32
    %58 = arith.maxsi %c0_i32_26, %57 : i32
    %59 = arith.minsi %c63_i32_27, %58 : i32
    %60 = arith.index_cast %59 : i32 to index
    %c0_28 = arith.constant 0 : index
    %61 = vector.load %arg1[%60, %c0_28] : memref<64x128xf32, #tpu.memory_space<vmem>>, vector<1x128xf32>
    %62 = arith.index_cast %c7_i32 : i32 to index
    %c0_29 = arith.constant 0 : index
    %63 = vector.load %arg9[%62, %c0_29] : memref<8x128xf32, #tpu.memory_space<vmem>>, vector<1x128xf32>
    tpu.vector_store %arg9[%62, %c0_29], %61 {strides = array<i32>} : memref<8x128xf32, #tpu.memory_space<vmem>>, vector<1x128xf32>,
    %c8_i32 = arith.constant 8 : i32
    %c0_30 = arith.constant 0 : index
    %c0_31 = arith.constant 0 : index
    %64 = vector.load %arg9[%c0_30, %c0_31] : memref<8x128xf32, #tpu.memory_space<vmem>>, vector<8x128xf32>
    %65 = arith.truncf %64 : vector<8x128xf32> to vector<8x128xbf16>
    %c0_32 = arith.constant 0 : index
    %c0_33 = arith.constant 0 : index
    %66 = vector.load %arg2[%c0_32, %c0_33] : memref<128x384xbf16, #tpu.memory_space<vmem>>, vector<128x384xbf16>
    %cst = arith.constant dense<0.000000e+00> : vector<8x384xf32>
    %67 = tpu.matmul %65, %66, %cst {dimension_numbers = #tpu.dot_dimension_numbers<[1], [0], [0], [1], [0, 0, 1, 1], [], []>} : vector<8x128xbf16>, vector<128x384xbf16>, vector<8x384xf32> -> vector<8x384xf32>
    %c0_34 = arith.constant 0 : index
    %c0_35 = arith.constant 0 : index
    %68 = vector.load %arg4[%c0_34, %c0_35] : memref<1x384xf32, #tpu.memory_space<vmem>>, vector<1x384xf32>
    %69 = vector.broadcast %68 : vector<1x384xf32> to vector<8x384xf32>
    %70 = arith.addf %67, %69 : vector<8x384xf32>
    %c0_36 = arith.constant 0 : index
    %c0_37 = arith.constant 0 : index
    %71 = vector.load %arg10[%c0_36, %c0_37] : memref<8x384xf32, #tpu.memory_space<vmem>>, vector<8x384xf32>
    tpu.vector_store %arg10[%c0_36, %c0_37], %70 {strides = array<i32>} : memref<8x384xf32, #tpu.memory_space<vmem>>, vector<8x384xf32>,
    %c0_38 = arith.constant 0 : index
    %c0_39 = arith.constant 0 : index
    %72 = vector.load %arg6[%c0_38, %c0_39] : memref<1x128xf32, #tpu.memory_space<vmem>>, vector<1x128xf32>
    %c0_i32_40 = arith.constant 0 : i32
    %73 = arith.index_cast %c0_i32_40 : i32 to index
    %c0_41 = arith.constant 0 : index
    %74 = vector.load %arg10[%73, %c0_41] : memref<8x384xf32, #tpu.memory_space<vmem>>, vector<1x384xf32>
    %75 = arith.truncf %72 : vector<1x128xf32> to vector<1x128xbf16>
    %c0_42 = arith.constant 0 : index
    %c0_43 = arith.constant 0 : index
    %76 = vector.load %arg3[%c0_42, %c0_43] : memref<128x384xbf16, #tpu.memory_space<vmem>>, vector<128x384xbf16>
    %cst_44 = arith.constant dense<0.000000e+00> : vector<1x384xf32>
    %77 = tpu.matmul %75, %76, %cst_44 {dimension_numbers = #tpu.dot_dimension_numbers<[1], [0], [0], [1], [0, 0, 1, 1], [], []>} : vector<1x128xbf16>, vector<128x384xbf16>, vector<1x384xf32> -> vector<1x384xf32>
    %c0_45 = arith.constant 0 : index
    %c0_46 = arith.constant 0 : index
    %78 = vector.load %arg5[%c0_45, %c0_46] : memref<1x384xf32, #tpu.memory_space<vmem>>, vector<1x384xf32>
    %79 = arith.addf %77, %78 : vector<1x384xf32>
    %80 = vector.extract_strided_slice %74 {offsets = [0, 0], sizes = [1, 128], strides = [1, 1]} : vector<1x384xf32> to vector<1x128xf32>
    %81 = vector.extract_strided_slice %79 {offsets = [0, 0], sizes = [1, 128], strides = [1, 1]} : vector<1x384xf32> to vector<1x128xf32>
    %82 = arith.addf %80, %81 : vector<1x128xf32>
    %83 = arith.negf %82 : vector<1x128xf32>
    %84 = math.exp %83 : vector<1x128xf32>
    %cst_47 = arith.constant 1.000000e+00 : f32
    %85 = vector.broadcast %cst_47 : f32 to vector<1x128xf32>
    %86 = arith.addf %85, %84 : vector<1x128xf32>
    %87 = arith.divf %85, %86 : vector<1x128xf32>
    %88 = vector.extract_strided_slice %74 {offsets = [0, 128], sizes = [1, 128], strides = [1, 1]} : vector<1x384xf32> to vector<1x128xf32>
    %89 = vector.extract_strided_slice %79 {offsets = [0, 128], sizes = [1, 128], strides = [1, 1]} : vector<1x384xf32> to vector<1x128xf32>
    %90 = arith.addf %88, %89 : vector<1x128xf32>
    %91 = arith.negf %90 : vector<1x128xf32>
    %92 = math.exp %91 : vector<1x128xf32>
    %cst_48 = arith.constant 1.000000e+00 : f32
    %93 = vector.broadcast %cst_48 : f32 to vector<1x128xf32>
    %94 = arith.addf %93, %92 : vector<1x128xf32>
    %95 = arith.divf %93, %94 : vector<1x128xf32>
    %96 = vector.extract_strided_slice %74 {offsets = [0, 256], sizes = [1, 128], strides = [1, 1]} : vector<1x384xf32> to vector<1x128xf32>
    %97 = vector.extract_strided_slice %79 {offsets = [0, 256], sizes = [1, 128], strides = [1, 1]} : vector<1x384xf32> to vector<1x128xf32>
    %98 = arith.mulf %87, %97 : vector<1x128xf32>
    %99 = arith.addf %96, %98 : vector<1x128xf32>
    %100 = math.tanh %99 : vector<1x128xf32>
    %cst_49 = arith.constant 1.000000e+00 : f32
    %101 = vector.broadcast %cst_49 : f32 to vector<1x128xf32>
    %102 = arith.subf %101, %95 : vector<1x128xf32>
    %103 = arith.mulf %102, %100 : vector<1x128xf32>
    %104 = arith.mulf %95, %72 : vector<1x128xf32>
    %105 = arith.addf %103, %104 : vector<1x128xf32>
    %106 = arith.index_cast %c0_i32_40 : i32 to index
    %c0_50 = arith.constant 0 : index
    %107 = vector.load %arg7[%106, %c0_50] : memref<8x128xf32, #tpu.memory_space<vmem>>, vector<1x128xf32>
    tpu.vector_store %arg7[%106, %c0_50], %105 {strides = array<i32>} : memref<8x128xf32, #tpu.memory_space<vmem>>, vector<1x128xf32>,
    %c1_i32_51 = arith.constant 1 : i32
    %108 = arith.index_cast %c1_i32_51 : i32 to index
    %c0_52 = arith.constant 0 : index
    %109 = vector.load %arg10[%108, %c0_52] : memref<8x384xf32, #tpu.memory_space<vmem>>, vector<1x384xf32>
    %110 = arith.truncf %105 : vector<1x128xf32> to vector<1x128xbf16>
    %c0_53 = arith.constant 0 : index
    %c0_54 = arith.constant 0 : index
    %111 = vector.load %arg3[%c0_53, %c0_54] : memref<128x384xbf16, #tpu.memory_space<vmem>>, vector<128x384xbf16>
    %cst_55 = arith.constant dense<0.000000e+00> : vector<1x384xf32>
    %112 = tpu.matmul %110, %111, %cst_55 {dimension_numbers = #tpu.dot_dimension_numbers<[1], [0], [0], [1], [0, 0, 1, 1], [], []>} : vector<1x128xbf16>, vector<128x384xbf16>, vector<1x384xf32> -> vector<1x384xf32>
    %c0_56 = arith.constant 0 : index
    %c0_57 = arith.constant 0 : index
    %113 = vector.load %arg5[%c0_56, %c0_57] : memref<1x384xf32, #tpu.memory_space<vmem>>, vector<1x384xf32>
    %114 = arith.addf %112, %113 : vector<1x384xf32>
    %115 = vector.extract_strided_slice %109 {offsets = [0, 0], sizes = [1, 128], strides = [1, 1]} : vector<1x384xf32> to vector<1x128xf32>
    %116 = vector.extract_strided_slice %114 {offsets = [0, 0], sizes = [1, 128], strides = [1, 1]} : vector<1x384xf32> to vector<1x128xf32>
    %117 = arith.addf %115, %116 : vector<1x128xf32>
    %118 = arith.negf %117 : vector<1x128xf32>
    %119 = math.exp %118 : vector<1x128xf32>
    %cst_58 = arith.constant 1.000000e+00 : f32
    %120 = vector.broadcast %cst_58 : f32 to vector<1x128xf32>
    %121 = arith.addf %120, %119 : vector<1x128xf32>
    %122 = arith.divf %120, %121 : vector<1x128xf32>
    %123 = vector.extract_strided_slice %109 {offsets = [0, 128], sizes = [1, 128], strides = [1, 1]} : vector<1x384xf32> to vector<1x128xf32>
    %124 = vector.extract_strided_slice %114 {offsets = [0, 128], sizes = [1, 128], strides = [1, 1]} : vector<1x384xf32> to vector<1x128xf32>
    %125 = arith.addf %123, %124 : vector<1x128xf32>
    %126 = arith.negf %125 : vector<1x128xf32>
    %127 = math.exp %126 : vector<1x128xf32>
    %cst_59 = arith.constant 1.000000e+00 : f32
    %128 = vector.broadcast %cst_59 : f32 to vector<1x128xf32>
    %129 = arith.addf %128, %127 : vector<1x128xf32>
    %130 = arith.divf %128, %129 : vector<1x128xf32>
    %131 = vector.extract_strided_slice %109 {offsets = [0, 256], sizes = [1, 128], strides = [1, 1]} : vector<1x384xf32> to vector<1x128xf32>
    %132 = vector.extract_strided_slice %114 {offsets = [0, 256], sizes = [1, 128], strides = [1, 1]} : vector<1x384xf32> to vector<1x128xf32>
    %133 = arith.mulf %122, %132 : vector<1x128xf32>
    %134 = arith.addf %131, %133 : vector<1x128xf32>
    %135 = math.tanh %134 : vector<1x128xf32>
    %cst_60 = arith.constant 1.000000e+00 : f32
    %136 = vector.broadcast %cst_60 : f32 to vector<1x128xf32>
    %137 = arith.subf %136, %130 : vector<1x128xf32>
    %138 = arith.mulf %137, %135 : vector<1x128xf32>
    %139 = arith.mulf %130, %105 : vector<1x128xf32>
    %140 = arith.addf %138, %139 : vector<1x128xf32>
    %141 = arith.index_cast %c1_i32_51 : i32 to index
    %c0_61 = arith.constant 0 : index
    %142 = vector.load %arg7[%141, %c0_61] : memref<8x128xf32, #tpu.memory_space<vmem>>, vector<1x128xf32>
    tpu.vector_store %arg7[%141, %c0_61], %140 {strides = array<i32>} : memref<8x128xf32, #tpu.memory_space<vmem>>, vector<1x128xf32>,
    %c2_i32_62 = arith.constant 2 : i32
    %143 = arith.index_cast %c2_i32_62 : i32 to index
    %c0_63 = arith.constant 0 : index
    %144 = vector.load %arg10[%143, %c0_63] : memref<8x384xf32, #tpu.memory_space<vmem>>, vector<1x384xf32>
    %145 = arith.truncf %140 : vector<1x128xf32> to vector<1x128xbf16>
    %c0_64 = arith.constant 0 : index
    %c0_65 = arith.constant 0 : index
    %146 = vector.load %arg3[%c0_64, %c0_65] : memref<128x384xbf16, #tpu.memory_space<vmem>>, vector<128x384xbf16>
    %cst_66 = arith.constant dense<0.000000e+00> : vector<1x384xf32>
    %147 = tpu.matmul %145, %146, %cst_66 {dimension_numbers = #tpu.dot_dimension_numbers<[1], [0], [0], [1], [0, 0, 1, 1], [], []>} : vector<1x128xbf16>, vector<128x384xbf16>, vector<1x384xf32> -> vector<1x384xf32>
    %c0_67 = arith.constant 0 : index
    %c0_68 = arith.constant 0 : index
    %148 = vector.load %arg5[%c0_67, %c0_68] : memref<1x384xf32, #tpu.memory_space<vmem>>, vector<1x384xf32>
    %149 = arith.addf %147, %148 : vector<1x384xf32>
    %150 = vector.extract_strided_slice %144 {offsets = [0, 0], sizes = [1, 128], strides = [1, 1]} : vector<1x384xf32> to vector<1x128xf32>
    %151 = vector.extract_strided_slice %149 {offsets = [0, 0], sizes = [1, 128], strides = [1, 1]} : vector<1x384xf32> to vector<1x128xf32>
    %152 = arith.addf %150, %151 : vector<1x128xf32>
    %153 = arith.negf %152 : vector<1x128xf32>
    %154 = math.exp %153 : vector<1x128xf32>
    %cst_69 = arith.constant 1.000000e+00 : f32
    %155 = vector.broadcast %cst_69 : f32 to vector<1x128xf32>
    %156 = arith.addf %155, %154 : vector<1x128xf32>
    %157 = arith.divf %155, %156 : vector<1x128xf32>
    %158 = vector.extract_strided_slice %144 {offsets = [0, 128], sizes = [1, 128], strides = [1, 1]} : vector<1x384xf32> to vector<1x128xf32>
    %159 = vector.extract_strided_slice %149 {offsets = [0, 128], sizes = [1, 128], strides = [1, 1]} : vector<1x384xf32> to vector<1x128xf32>
    %160 = arith.addf %158, %159 : vector<1x128xf32>
    %161 = arith.negf %160 : vector<1x128xf32>
    %162 = math.exp %161 : vector<1x128xf32>
    %cst_70 = arith.constant 1.000000e+00 : f32
    %163 = vector.broadcast %cst_70 : f32 to vector<1x128xf32>
    %164 = arith.addf %163, %162 : vector<1x128xf32>
    %165 = arith.divf %163, %164 : vector<1x128xf32>
    %166 = vector.extract_strided_slice %144 {offsets = [0, 256], sizes = [1, 128], strides = [1, 1]} : vector<1x384xf32> to vector<1x128xf32>
    %167 = vector.extract_strided_slice %149 {offsets = [0, 256], sizes = [1, 128], strides = [1, 1]} : vector<1x384xf32> to vector<1x128xf32>
    %168 = arith.mulf %157, %167 : vector<1x128xf32>
    %169 = arith.addf %166, %168 : vector<1x128xf32>
    %170 = math.tanh %169 : vector<1x128xf32>
    %cst_71 = arith.constant 1.000000e+00 : f32
    %171 = vector.broadcast %cst_71 : f32 to vector<1x128xf32>
    %172 = arith.subf %171, %165 : vector<1x128xf32>
    %173 = arith.mulf %172, %170 : vector<1x128xf32>
    %174 = arith.mulf %165, %140 : vector<1x128xf32>
    %175 = arith.addf %173, %174 : vector<1x128xf32>
    %176 = arith.index_cast %c2_i32_62 : i32 to index
    %c0_72 = arith.constant 0 : index
    %177 = vector.load %arg7[%176, %c0_72] : memref<8x128xf32, #tpu.memory_space<vmem>>, vector<1x128xf32>
    tpu.vector_store %arg7[%176, %c0_72], %175 {strides = array<i32>} : memref<8x128xf32, #tpu.memory_space<vmem>>, vector<1x128xf32>,
    %c3_i32_73 = arith.constant 3 : i32
    %178 = arith.index_cast %c3_i32_73 : i32 to index
    %c0_74 = arith.constant 0 : index
    %179 = vector.load %arg10[%178, %c0_74] : memref<8x384xf32, #tpu.memory_space<vmem>>, vector<1x384xf32>
    %180 = arith.truncf %175 : vector<1x128xf32> to vector<1x128xbf16>
    %c0_75 = arith.constant 0 : index
    %c0_76 = arith.constant 0 : index
    %181 = vector.load %arg3[%c0_75, %c0_76] : memref<128x384xbf16, #tpu.memory_space<vmem>>, vector<128x384xbf16>
    %cst_77 = arith.constant dense<0.000000e+00> : vector<1x384xf32>
    %182 = tpu.matmul %180, %181, %cst_77 {dimension_numbers = #tpu.dot_dimension_numbers<[1], [0], [0], [1], [0, 0, 1, 1], [], []>} : vector<1x128xbf16>, vector<128x384xbf16>, vector<1x384xf32> -> vector<1x384xf32>
    %c0_78 = arith.constant 0 : index
    %c0_79 = arith.constant 0 : index
    %183 = vector.load %arg5[%c0_78, %c0_79] : memref<1x384xf32, #tpu.memory_space<vmem>>, vector<1x384xf32>
    %184 = arith.addf %182, %183 : vector<1x384xf32>
    %185 = vector.extract_strided_slice %179 {offsets = [0, 0], sizes = [1, 128], strides = [1, 1]} : vector<1x384xf32> to vector<1x128xf32>
    %186 = vector.extract_strided_slice %184 {offsets = [0, 0], sizes = [1, 128], strides = [1, 1]} : vector<1x384xf32> to vector<1x128xf32>
    %187 = arith.addf %185, %186 : vector<1x128xf32>
    %188 = arith.negf %187 : vector<1x128xf32>
    %189 = math.exp %188 : vector<1x128xf32>
    %cst_80 = arith.constant 1.000000e+00 : f32
    %190 = vector.broadcast %cst_80 : f32 to vector<1x128xf32>
    %191 = arith.addf %190, %189 : vector<1x128xf32>
    %192 = arith.divf %190, %191 : vector<1x128xf32>
    %193 = vector.extract_strided_slice %179 {offsets = [0, 128], sizes = [1, 128], strides = [1, 1]} : vector<1x384xf32> to vector<1x128xf32>
    %194 = vector.extract_strided_slice %184 {offsets = [0, 128], sizes = [1, 128], strides = [1, 1]} : vector<1x384xf32> to vector<1x128xf32>
    %195 = arith.addf %193, %194 : vector<1x128xf32>
    %196 = arith.negf %195 : vector<1x128xf32>
    %197 = math.exp %196 : vector<1x128xf32>
    %cst_81 = arith.constant 1.000000e+00 : f32
    %198 = vector.broadcast %cst_81 : f32 to vector<1x128xf32>
    %199 = arith.addf %198, %197 : vector<1x128xf32>
    %200 = arith.divf %198, %199 : vector<1x128xf32>
    %201 = vector.extract_strided_slice %179 {offsets = [0, 256], sizes = [1, 128], strides = [1, 1]} : vector<1x384xf32> to vector<1x128xf32>
    %202 = vector.extract_strided_slice %184 {offsets = [0, 256], sizes = [1, 128], strides = [1, 1]} : vector<1x384xf32> to vector<1x128xf32>
    %203 = arith.mulf %192, %202 : vector<1x128xf32>
    %204 = arith.addf %201, %203 : vector<1x128xf32>
    %205 = math.tanh %204 : vector<1x128xf32>
    %cst_82 = arith.constant 1.000000e+00 : f32
    %206 = vector.broadcast %cst_82 : f32 to vector<1x128xf32>
    %207 = arith.subf %206, %200 : vector<1x128xf32>
    %208 = arith.mulf %207, %205 : vector<1x128xf32>
    %209 = arith.mulf %200, %175 : vector<1x128xf32>
    %210 = arith.addf %208, %209 : vector<1x128xf32>
    %211 = arith.index_cast %c3_i32_73 : i32 to index
    %c0_83 = arith.constant 0 : index
    %212 = vector.load %arg7[%211, %c0_83] : memref<8x128xf32, #tpu.memory_space<vmem>>, vector<1x128xf32>
    tpu.vector_store %arg7[%211, %c0_83], %210 {strides = array<i32>} : memref<8x128xf32, #tpu.memory_space<vmem>>, vector<1x128xf32>,
    %c4_i32_84 = arith.constant 4 : i32
    %213 = arith.index_cast %c4_i32_84 : i32 to index
    %c0_85 = arith.constant 0 : index
    %214 = vector.load %arg10[%213, %c0_85] : memref<8x384xf32, #tpu.memory_space<vmem>>, vector<1x384xf32>
    %215 = arith.truncf %210 : vector<1x128xf32> to vector<1x128xbf16>
    %c0_86 = arith.constant 0 : index
    %c0_87 = arith.constant 0 : index
    %216 = vector.load %arg3[%c0_86, %c0_87] : memref<128x384xbf16, #tpu.memory_space<vmem>>, vector<128x384xbf16>
    %cst_88 = arith.constant dense<0.000000e+00> : vector<1x384xf32>
    %217 = tpu.matmul %215, %216, %cst_88 {dimension_numbers = #tpu.dot_dimension_numbers<[1], [0], [0], [1], [0, 0, 1, 1], [], []>} : vector<1x128xbf16>, vector<128x384xbf16>, vector<1x384xf32> -> vector<1x384xf32>
    %c0_89 = arith.constant 0 : index
    %c0_90 = arith.constant 0 : index
    %218 = vector.load %arg5[%c0_89, %c0_90] : memref<1x384xf32, #tpu.memory_space<vmem>>, vector<1x384xf32>
    %219 = arith.addf %217, %218 : vector<1x384xf32>
    %220 = vector.extract_strided_slice %214 {offsets = [0, 0], sizes = [1, 128], strides = [1, 1]} : vector<1x384xf32> to vector<1x128xf32>
    %221 = vector.extract_strided_slice %219 {offsets = [0, 0], sizes = [1, 128], strides = [1, 1]} : vector<1x384xf32> to vector<1x128xf32>
    %222 = arith.addf %220, %221 : vector<1x128xf32>
    %223 = arith.negf %222 : vector<1x128xf32>
    %224 = math.exp %223 : vector<1x128xf32>
    %cst_91 = arith.constant 1.000000e+00 : f32
    %225 = vector.broadcast %cst_91 : f32 to vector<1x128xf32>
    %226 = arith.addf %225, %224 : vector<1x128xf32>
    %227 = arith.divf %225, %226 : vector<1x128xf32>
    %228 = vector.extract_strided_slice %214 {offsets = [0, 128], sizes = [1, 128], strides = [1, 1]} : vector<1x384xf32> to vector<1x128xf32>
    %229 = vector.extract_strided_slice %219 {offsets = [0, 128], sizes = [1, 128], strides = [1, 1]} : vector<1x384xf32> to vector<1x128xf32>
    %230 = arith.addf %228, %229 : vector<1x128xf32>
    %231 = arith.negf %230 : vector<1x128xf32>
    %232 = math.exp %231 : vector<1x128xf32>
    %cst_92 = arith.constant 1.000000e+00 : f32
    %233 = vector.broadcast %cst_92 : f32 to vector<1x128xf32>
    %234 = arith.addf %233, %232 : vector<1x128xf32>
    %235 = arith.divf %233, %234 : vector<1x128xf32>
    %236 = vector.extract_strided_slice %214 {offsets = [0, 256], sizes = [1, 128], strides = [1, 1]} : vector<1x384xf32> to vector<1x128xf32>
    %237 = vector.extract_strided_slice %219 {offsets = [0, 256], sizes = [1, 128], strides = [1, 1]} : vector<1x384xf32> to vector<1x128xf32>
    %238 = arith.mulf %227, %237 : vector<1x128xf32>
    %239 = arith.addf %236, %238 : vector<1x128xf32>
    %240 = math.tanh %239 : vector<1x128xf32>
    %cst_93 = arith.constant 1.000000e+00 : f32
    %241 = vector.broadcast %cst_93 : f32 to vector<1x128xf32>
    %242 = arith.subf %241, %235 : vector<1x128xf32>
    %243 = arith.mulf %242, %240 : vector<1x128xf32>
    %244 = arith.mulf %235, %210 : vector<1x128xf32>
    %245 = arith.addf %243, %244 : vector<1x128xf32>
    %246 = arith.index_cast %c4_i32_84 : i32 to index
    %c0_94 = arith.constant 0 : index
    %247 = vector.load %arg7[%246, %c0_94] : memref<8x128xf32, #tpu.memory_space<vmem>>, vector<1x128xf32>
    tpu.vector_store %arg7[%246, %c0_94], %245 {strides = array<i32>} : memref<8x128xf32, #tpu.memory_space<vmem>>, vector<1x128xf32>,
    %c5_i32_95 = arith.constant 5 : i32
    %248 = arith.index_cast %c5_i32_95 : i32 to index
    %c0_96 = arith.constant 0 : index
    %249 = vector.load %arg10[%248, %c0_96] : memref<8x384xf32, #tpu.memory_space<vmem>>, vector<1x384xf32>
    %250 = arith.truncf %245 : vector<1x128xf32> to vector<1x128xbf16>
    %c0_97 = arith.constant 0 : index
    %c0_98 = arith.constant 0 : index
    %251 = vector.load %arg3[%c0_97, %c0_98] : memref<128x384xbf16, #tpu.memory_space<vmem>>, vector<128x384xbf16>
    %cst_99 = arith.constant dense<0.000000e+00> : vector<1x384xf32>
    %252 = tpu.matmul %250, %251, %cst_99 {dimension_numbers = #tpu.dot_dimension_numbers<[1], [0], [0], [1], [0, 0, 1, 1], [], []>} : vector<1x128xbf16>, vector<128x384xbf16>, vector<1x384xf32> -> vector<1x384xf32>
    %c0_100 = arith.constant 0 : index
    %c0_101 = arith.constant 0 : index
    %253 = vector.load %arg5[%c0_100, %c0_101] : memref<1x384xf32, #tpu.memory_space<vmem>>, vector<1x384xf32>
    %254 = arith.addf %252, %253 : vector<1x384xf32>
    %255 = vector.extract_strided_slice %249 {offsets = [0, 0], sizes = [1, 128], strides = [1, 1]} : vector<1x384xf32> to vector<1x128xf32>
    %256 = vector.extract_strided_slice %254 {offsets = [0, 0], sizes = [1, 128], strides = [1, 1]} : vector<1x384xf32> to vector<1x128xf32>
    %257 = arith.addf %255, %256 : vector<1x128xf32>
    %258 = arith.negf %257 : vector<1x128xf32>
    %259 = math.exp %258 : vector<1x128xf32>
    %cst_102 = arith.constant 1.000000e+00 : f32
    %260 = vector.broadcast %cst_102 : f32 to vector<1x128xf32>
    %261 = arith.addf %260, %259 : vector<1x128xf32>
    %262 = arith.divf %260, %261 : vector<1x128xf32>
    %263 = vector.extract_strided_slice %249 {offsets = [0, 128], sizes = [1, 128], strides = [1, 1]} : vector<1x384xf32> to vector<1x128xf32>
    %264 = vector.extract_strided_slice %254 {offsets = [0, 128], sizes = [1, 128], strides = [1, 1]} : vector<1x384xf32> to vector<1x128xf32>
    %265 = arith.addf %263, %264 : vector<1x128xf32>
    %266 = arith.negf %265 : vector<1x128xf32>
    %267 = math.exp %266 : vector<1x128xf32>
    %cst_103 = arith.constant 1.000000e+00 : f32
    %268 = vector.broadcast %cst_103 : f32 to vector<1x128xf32>
    %269 = arith.addf %268, %267 : vector<1x128xf32>
    %270 = arith.divf %268, %269 : vector<1x128xf32>
    %271 = vector.extract_strided_slice %249 {offsets = [0, 256], sizes = [1, 128], strides = [1, 1]} : vector<1x384xf32> to vector<1x128xf32>
    %272 = vector.extract_strided_slice %254 {offsets = [0, 256], sizes = [1, 128], strides = [1, 1]} : vector<1x384xf32> to vector<1x128xf32>
    %273 = arith.mulf %262, %272 : vector<1x128xf32>
    %274 = arith.addf %271, %273 : vector<1x128xf32>
    %275 = math.tanh %274 : vector<1x128xf32>
    %cst_104 = arith.constant 1.000000e+00 : f32
    %276 = vector.broadcast %cst_104 : f32 to vector<1x128xf32>
    %277 = arith.subf %276, %270 : vector<1x128xf32>
    %278 = arith.mulf %277, %275 : vector<1x128xf32>
    %279 = arith.mulf %270, %245 : vector<1x128xf32>
    %280 = arith.addf %278, %279 : vector<1x128xf32>
    %281 = arith.index_cast %c5_i32_95 : i32 to index
    %c0_105 = arith.constant 0 : index
    %282 = vector.load %arg7[%281, %c0_105] : memref<8x128xf32, #tpu.memory_space<vmem>>, vector<1x128xf32>
    tpu.vector_store %arg7[%281, %c0_105], %280 {strides = array<i32>} : memref<8x128xf32, #tpu.memory_space<vmem>>, vector<1x128xf32>,
    %c6_i32_106 = arith.constant 6 : i32
    %283 = arith.index_cast %c6_i32_106 : i32 to index
    %c0_107 = arith.constant 0 : index
    %284 = vector.load %arg10[%283, %c0_107] : memref<8x384xf32, #tpu.memory_space<vmem>>, vector<1x384xf32>
    %285 = arith.truncf %280 : vector<1x128xf32> to vector<1x128xbf16>
    %c0_108 = arith.constant 0 : index
    %c0_109 = arith.constant 0 : index
    %286 = vector.load %arg3[%c0_108, %c0_109] : memref<128x384xbf16, #tpu.memory_space<vmem>>, vector<128x384xbf16>
    %cst_110 = arith.constant dense<0.000000e+00> : vector<1x384xf32>
    %287 = tpu.matmul %285, %286, %cst_110 {dimension_numbers = #tpu.dot_dimension_numbers<[1], [0], [0], [1], [0, 0, 1, 1], [], []>} : vector<1x128xbf16>, vector<128x384xbf16>, vector<1x384xf32> -> vector<1x384xf32>
    %c0_111 = arith.constant 0 : index
    %c0_112 = arith.constant 0 : index
    %288 = vector.load %arg5[%c0_111, %c0_112] : memref<1x384xf32, #tpu.memory_space<vmem>>, vector<1x384xf32>
    %289 = arith.addf %287, %288 : vector<1x384xf32>
    %290 = vector.extract_strided_slice %284 {offsets = [0, 0], sizes = [1, 128], strides = [1, 1]} : vector<1x384xf32> to vector<1x128xf32>
    %291 = vector.extract_strided_slice %289 {offsets = [0, 0], sizes = [1, 128], strides = [1, 1]} : vector<1x384xf32> to vector<1x128xf32>
    %292 = arith.addf %290, %291 : vector<1x128xf32>
    %293 = arith.negf %292 : vector<1x128xf32>
    %294 = math.exp %293 : vector<1x128xf32>
    %cst_113 = arith.constant 1.000000e+00 : f32
    %295 = vector.broadcast %cst_113 : f32 to vector<1x128xf32>
    %296 = arith.addf %295, %294 : vector<1x128xf32>
    %297 = arith.divf %295, %296 : vector<1x128xf32>
    %298 = vector.extract_strided_slice %284 {offsets = [0, 128], sizes = [1, 128], strides = [1, 1]} : vector<1x384xf32> to vector<1x128xf32>
    %299 = vector.extract_strided_slice %289 {offsets = [0, 128], sizes = [1, 128], strides = [1, 1]} : vector<1x384xf32> to vector<1x128xf32>
    %300 = arith.addf %298, %299 : vector<1x128xf32>
    %301 = arith.negf %300 : vector<1x128xf32>
    %302 = math.exp %301 : vector<1x128xf32>
    %cst_114 = arith.constant 1.000000e+00 : f32
    %303 = vector.broadcast %cst_114 : f32 to vector<1x128xf32>
    %304 = arith.addf %303, %302 : vector<1x128xf32>
    %305 = arith.divf %303, %304 : vector<1x128xf32>
    %306 = vector.extract_strided_slice %284 {offsets = [0, 256], sizes = [1, 128], strides = [1, 1]} : vector<1x384xf32> to vector<1x128xf32>
    %307 = vector.extract_strided_slice %289 {offsets = [0, 256], sizes = [1, 128], strides = [1, 1]} : vector<1x384xf32> to vector<1x128xf32>
    %308 = arith.mulf %297, %307 : vector<1x128xf32>
    %309 = arith.addf %306, %308 : vector<1x128xf32>
    %310 = math.tanh %309 : vector<1x128xf32>
    %cst_115 = arith.constant 1.000000e+00 : f32
    %311 = vector.broadcast %cst_115 : f32 to vector<1x128xf32>
    %312 = arith.subf %311, %305 : vector<1x128xf32>
    %313 = arith.mulf %312, %310 : vector<1x128xf32>
    %314 = arith.mulf %305, %280 : vector<1x128xf32>
    %315 = arith.addf %313, %314 : vector<1x128xf32>
    %316 = arith.index_cast %c6_i32_106 : i32 to index
    %c0_116 = arith.constant 0 : index
    %317 = vector.load %arg7[%316, %c0_116] : memref<8x128xf32, #tpu.memory_space<vmem>>, vector<1x128xf32>
    tpu.vector_store %arg7[%316, %c0_116], %315 {strides = array<i32>} : memref<8x128xf32, #tpu.memory_space<vmem>>, vector<1x128xf32>,
    %c7_i32_117 = arith.constant 7 : i32
    %318 = arith.index_cast %c7_i32_117 : i32 to index
    %c0_118 = arith.constant 0 : index
    %319 = vector.load %arg10[%318, %c0_118] : memref<8x384xf32, #tpu.memory_space<vmem>>, vector<1x384xf32>
    %320 = arith.truncf %315 : vector<1x128xf32> to vector<1x128xbf16>
    %c0_119 = arith.constant 0 : index
    %c0_120 = arith.constant 0 : index
    %321 = vector.load %arg3[%c0_119, %c0_120] : memref<128x384xbf16, #tpu.memory_space<vmem>>, vector<128x384xbf16>
    %cst_121 = arith.constant dense<0.000000e+00> : vector<1x384xf32>
    %322 = tpu.matmul %320, %321, %cst_121 {dimension_numbers = #tpu.dot_dimension_numbers<[1], [0], [0], [1], [0, 0, 1, 1], [], []>} : vector<1x128xbf16>, vector<128x384xbf16>, vector<1x384xf32> -> vector<1x384xf32>
    %c0_122 = arith.constant 0 : index
    %c0_123 = arith.constant 0 : index
    %323 = vector.load %arg5[%c0_122, %c0_123] : memref<1x384xf32, #tpu.memory_space<vmem>>, vector<1x384xf32>
    %324 = arith.addf %322, %323 : vector<1x384xf32>
    %325 = vector.extract_strided_slice %319 {offsets = [0, 0], sizes = [1, 128], strides = [1, 1]} : vector<1x384xf32> to vector<1x128xf32>
    %326 = vector.extract_strided_slice %324 {offsets = [0, 0], sizes = [1, 128], strides = [1, 1]} : vector<1x384xf32> to vector<1x128xf32>
    %327 = arith.addf %325, %326 : vector<1x128xf32>
    %328 = arith.negf %327 : vector<1x128xf32>
    %329 = math.exp %328 : vector<1x128xf32>
    %cst_124 = arith.constant 1.000000e+00 : f32
    %330 = vector.broadcast %cst_124 : f32 to vector<1x128xf32>
    %331 = arith.addf %330, %329 : vector<1x128xf32>
    %332 = arith.divf %330, %331 : vector<1x128xf32>
    %333 = vector.extract_strided_slice %319 {offsets = [0, 128], sizes = [1, 128], strides = [1, 1]} : vector<1x384xf32> to vector<1x128xf32>
    %334 = vector.extract_strided_slice %324 {offsets = [0, 128], sizes = [1, 128], strides = [1, 1]} : vector<1x384xf32> to vector<1x128xf32>
    %335 = arith.addf %333, %334 : vector<1x128xf32>
    %336 = arith.negf %335 : vector<1x128xf32>
    %337 = math.exp %336 : vector<1x128xf32>
    %cst_125 = arith.constant 1.000000e+00 : f32
    %338 = vector.broadcast %cst_125 : f32 to vector<1x128xf32>
    %339 = arith.addf %338, %337 : vector<1x128xf32>
    %340 = arith.divf %338, %339 : vector<1x128xf32>
    %341 = vector.extract_strided_slice %319 {offsets = [0, 256], sizes = [1, 128], strides = [1, 1]} : vector<1x384xf32> to vector<1x128xf32>
    %342 = vector.extract_strided_slice %324 {offsets = [0, 256], sizes = [1, 128], strides = [1, 1]} : vector<1x384xf32> to vector<1x128xf32>
    %343 = arith.mulf %332, %342 : vector<1x128xf32>
    %344 = arith.addf %341, %343 : vector<1x128xf32>
    %345 = math.tanh %344 : vector<1x128xf32>
    %cst_126 = arith.constant 1.000000e+00 : f32
    %346 = vector.broadcast %cst_126 : f32 to vector<1x128xf32>
    %347 = arith.subf %346, %340 : vector<1x128xf32>
    %348 = arith.mulf %347, %345 : vector<1x128xf32>
    %349 = arith.mulf %340, %315 : vector<1x128xf32>
    %350 = arith.addf %348, %349 : vector<1x128xf32>
    %351 = arith.index_cast %c7_i32_117 : i32 to index
    %c0_127 = arith.constant 0 : index
    %352 = vector.load %arg7[%351, %c0_127] : memref<8x128xf32, #tpu.memory_space<vmem>>, vector<1x128xf32>
    tpu.vector_store %arg7[%351, %c0_127], %350 {strides = array<i32>} : memref<8x128xf32, #tpu.memory_space<vmem>>, vector<1x128xf32>,
    %c8_i32_128 = arith.constant 8 : i32
    %c0_129 = arith.constant 0 : index
    %c0_130 = arith.constant 0 : index
    %353 = vector.load %arg8[%c0_129, %c0_130] : memref<1x128xf32, #tpu.memory_space<vmem>>, vector<1x128xf32>
    tpu.vector_store %arg8[%c0_129, %c0_130], %350 {strides = array<i32>} : memref<1x128xf32, #tpu.memory_space<vmem>>, vector<1x128xf32>,
    return
  }
}

</mosaic_0001>

<bundles_post_ra>
// kernel: tpu_custom_call.1
= control target key start
LH: loop header
LB: loop body
LE: loop exit
PB: predicated region body
PF: predicated region fallthrough
CT: control target
= control target key end

     0   :  { %14 = vsyncpa [#allocation7], 0  ;;  %s4256_s0 = inlined_call_operand.hbm [shape: s32[8], index: 0, kind: input, shape index: {}]   ;;  %s4257_s1 = inlined_call_operand.hbm [shape: f32[64,128], index: 1, kind: input, shape index: {}]   ;;  %s4258_s2 = inlined_call_operand.hbm [shape: bf16[128,384], index: 2, kind: input, shape index: {}]   ;;  %s4259_s3 = inlined_call_operand.hbm [shape: bf16[128,384], index: 3, kind: input, shape index: {}]   ;;  %s4260_s4 = inlined_call_operand.vmem [shape: f32[1,384], index: 4, kind: input, shape index: {}]   ;;  %s4261_s5 = inlined_call_operand.vmem [shape: f32[1,384], index: 5, kind: input, shape index: {}]   ;;  %s4262_s6 = inlined_call_operand.vmem [shape: f32[1,128], index: 6, kind: input, shape index: {}]   ;;  %s4263_s7 = inlined_call_operand.hbm [shape: f32[8,128], index: 7, kind: output, shape index: {0}]   ;;  %s4264_s8 = inlined_call_operand.hbm [shape: f32[1,128], index: 8, kind: output, shape index: {1}]  }
   0x1   :  { %15 = vsyncpa [#allocation5], 0 }
   0x2   :  { %16 = vsyncpa [#allocation10], 0 }
   0x3   :  { %17 = vsyncpa [#allocation6], 0 }
   0x4   :  { %18 = vsyncpa [#allocation14], 0  ;;  %s3677_s27 = smov [#allocation9]   ;;  %s3547_s9 = scalar_lea.hbm %s4258_s2, 3072 }
   0x5   :  { %s44_s28 = sshll.u32 %s3677_s27, 4  ;;  %p3548_p0 = scmp.ne.s32.totalorder %s4258_s2, %s3547_s9  ;;  %s45_s28 = int_to_ptr.vmem [resolvable:$true] %s44_s28 }
   0x6   :  { %p3551_p1 = scmp.lt.u32.totalorder %s3547_s9, %s4258_s2 }
   0x8   :  { %p3553_p2 = pnand %p3551_p1, %p3548_p0 }
   0xa   :  { %3556 = shalt.err (!%p3553_p2)
}
   0xb   :  { %s3557_s14 = scalar_lea.vmem %s45_s28, 3072  ;;  %p3562_p4 = scmp.lt.s32.totalorder %s45_s28, %s45_s28 }
   0xc   :  { %p3558_p3 = scmp.ne.s32.totalorder %s45_s28, %s3557_s14  ;;  %p3563_p5 = scmp.lt.s32.totalorder %s3557_s14, %s3557_s14 }
   0xe   :  { %p3564_p6 = por %p3563_p5, %p3562_p4 }
  0x10   :  { %p3565_p7 = pnand %p3564_p6, %p3558_p3 }
  0x12   :  { %3568 = shalt.err (!%p3565_p7)
}
  0x13   :  { %s3678_s15 = smov 192   ;;  %s3679_s16 = smov 12  }
  0x14   :  { %50 = dma.hbm_to_vmem [thread:$0]  %s4258_s2, 3072, %s45_s28, [#allocation10], %s3678_s15, %s3678_s15, %s3679_s16  }
  0x15   :  { %s3569_s21 = scalar_lea.hbm %s4256_s0, 16 }
  0x16   :  { %p3570_p8 = scmp.ne.s32.totalorder %s4256_s0, %s3569_s21  ;;  %p3573_p9 = scmp.lt.u32.totalorder %s3569_s21, %s4256_s0 }
  0x18   :  { %p3575_p10 = pnand %p3573_p9, %p3570_p8 }
  0x1a   :  { %3578 = shalt.err (!%p3575_p10)
}
  0x1b   :  { %s3680_s26 = smov [#allocation4]   ;;  %s3681_s2 = smov [#allocation8]  }
  0x1c   :  { %26 = dma.hbm_to_smem %s4256_s0, 16, %s3680_s26, [#allocation7]  }
  0x1d   :  { %s32_s28 = sshll.u32 %s3681_s2, 4  ;;  %s3579_s10 = scalar_lea.hbm %s4257_s1, 1024  ;;  %s33_s28 = int_to_ptr.vmem [resolvable:$true] %s32_s28 }
  0x1e   :  { %p3580_p11 = scmp.ne.s32.totalorder %s4257_s1, %s3579_s10  ;;  %p3583_p12 = scmp.lt.u32.totalorder %s3579_s10, %s4257_s1 }
  0x20   :  { %p3585_p13 = pnand %p3583_p12, %p3580_p11 }
  0x22   :  { %3588 = shalt.err (!%p3585_p13)
}
  0x23   :  { %s3589_s17 = scalar_lea.vmem %s33_s28, 1024  ;;  %p3594_p1 = scmp.lt.s32.totalorder %s33_s28, %s33_s28 }
  0x24   :  { %p3590_p0 = scmp.ne.s32.totalorder %s33_s28, %s3589_s17  ;;  %p3595_p2 = scmp.lt.s32.totalorder %s3589_s17, %s3589_s17 }
  0x26   :  { %p3596_p3 = por %p3595_p2, %p3594_p1 }
  0x28   :  { %p3597_p4 = pnand %p3596_p3, %p3590_p0 }
  0x2a   :  { %3600 = shalt.err (!%p3597_p4)
}
  0x2b   :  { %s3682_s0 = smov 128   ;;  %s3683_s18 = smov 8  }
  0x2c   :  { %38 = dma.hbm_to_vmem [thread:$0]  %s4257_s1, 1024, %s33_s28, [#allocation5], %s3682_s0, %s3682_s0, %s3683_s18  }
  0x2d   :  { %s3684_s21 = smov [#allocation11]   ;;  %s3601_s25 = scalar_lea.hbm %s4259_s3, 3072 }
  0x2e   :  { %s56_s22 = sshll.u32 %s3684_s21, 4  ;;  %p3602_p5 = scmp.ne.s32.totalorder %s4259_s3, %s3601_s25  ;;  %s57_s22 = int_to_ptr.vmem [resolvable:$true] %s56_s22 }
  0x2f   :  { %p3605_p6 = scmp.lt.u32.totalorder %s3601_s25, %s4259_s3 }
  0x31   :  { %p3607_p7 = pnand %p3605_p6, %p3602_p5 }
  0x33   :  { %3610 = shalt.err (!%p3607_p7)
}
  0x34   :  { %s3611_s30 = scalar_lea.vmem %s57_s22, 3072  ;;  %p3616_p9 = scmp.lt.s32.totalorder %s57_s22, %s57_s22 }
  0x35   :  { %p3612_p8 = scmp.ne.s32.totalorder %s57_s22, %s3611_s30  ;;  %p3617_p10 = scmp.lt.s32.totalorder %s3611_s30, %s3611_s30 }
  0x37   :  { %p3618_p11 = por %p3617_p10, %p3616_p9 }
  0x39   :  { %p3619_p12 = pnand %p3618_p11, %p3612_p8 }
  0x3b   :  { %3622 = shalt.err (!%p3619_p12)
}
  0x3c   :  { %62 = dma.hbm_to_vmem [thread:$0]  %s4259_s3, 3072, %s57_s22, [#allocation10], %s3678_s15, %s3678_s15, %s3679_s16  }
  0x3d   :  { %3667 = dma.done.wait [#allocation7], 16  }
  0x3e   :  { %3668 = vsyncadd [#allocation7], 4294967280 }
  0x3f   :  { %3669 = dma.done.wait [#allocation5], 1024  }
  0x40   :  { %3670 = vsyncadd [#allocation5], 4294966272 }
  0x41   :  { %3671 = dma.done.wait [#allocation10], 6144  }
  0x42   :  { %3672 = vsyncadd [#allocation10], 4294961152 }
  0x43   :  { %81 = sfence }
  0x44   :  { %v3323_v0 = vld [vmem:[#allocation9 + $0x4] ss:$12 sps:$4 sm:$0xff]   ;;  %v3325_v1 = vld [vmem:[#allocation9] ss:$12 sps:$4 sm:$0xff]   ;;  %v3685_v2 = vmov 0.0   ;;  %v3686_v3 = vmov 0  }
  0x45   :  { %3130 = vmatprep.subr.bf16.mxu1 %v3685_v2  ;;  %358 = vmatprep.mubr.bf16.mxu0 %v3686_v3  ;;  %v3326_v4 = vld [vmem:[#allocation9 + $0x8] ss:$12 sps:$4 sm:$0xff]   ;;  %s3791_s9 = sld [smem:[#allocation4]]  ;;  %v3329_v6 = vld [vmem:[#allocation9 + $0x18] ss:$12 sps:$4 sm:$0xff]   ;;  %vm3687_vm0 = vmmov 0  }
  0x46   :  { %326 = vmatprep.subr.bf16.mxu0 %v3323_v0  ;;  %v3327_v5 = vld [vmem:[#allocation9 + $0x1c] ss:$12 sps:$4 sm:$0xff]   ;;  %3131 = vmatpush3.bf16.msra.mxu1 %v3326_v4  ;;  %v3330_v7 = vld [vmem:[#allocation9 + $0x20] ss:$12 sps:$4 sm:$0xff]   ;;  %v3334_v10 = vld [vmem:[#allocation9 + $0x38] ss:$12 sps:$4 sm:$0xff]  }
  0x47   :  { %327 = vmatpush1.bf16.msra.mxu0 %v3325_v1  ;;  %3132 = vmatprep.subr.bf16.mxu1 %v3685_v2  ;;  %v3331_v8 = vld [vmem:[#allocation9 + $0x34] ss:$12 sps:$4 sm:$0xff]   ;;  %v3333_v9 = vld [vmem:[#allocation9 + $0x30] ss:$12 sps:$4 sm:$0xff]   ;;  %v3335_v11 = vld [vmem:[#allocation9 + $0x4c] ss:$12 sps:$4 sm:$0xff]  }
  0x48   :  { %328 = vmatprep.subr.bf16.mxu0 %v3327_v5  ;;  %3146 = vmatprep.mubr.msk.bf16.mxu1 %vm3687_vm0, %v3685_v2  ;;  %s3796_s3 = sld [smem:[#allocation4 + $0x1]]  ;;  %v3337_v12 = vld [vmem:[#allocation9 + $0x48] ss:$12 sps:$4 sm:$0xff]   ;;  %v3338_v13 = vld [vmem:[#allocation9 + $0x50] ss:$12 sps:$4 sm:$0xff]   ;;  %s3807_s10 = sld [smem:[#allocation4 + $0x2]] }
  0x49   :  { %v3339_v14 = vld [vmem:[#allocation9 + $0x64] ss:$12 sps:$4 sm:$0xff]   ;;  %v3341_v15 = vld [vmem:[#allocation9 + $0x60] ss:$12 sps:$4 sm:$0xff]   ;;  %v3342_v16 = vld [vmem:[#allocation9 + $0x68] ss:$12 sps:$4 sm:$0xff]  }
  0x4a   :  { %3133 = vmatpush3.bf16.msra.mxu1 %v3330_v7  ;;  %v3343_v17 = vld [vmem:[#allocation9 + $0x7c] ss:$12 sps:$4 sm:$0xff]   ;;  %v3345_v18 = vld [vmem:[#allocation9 + $0x78] ss:$12 sps:$4 sm:$0xff]   ;;  %v3346_v20 = vld [vmem:[#allocation9 + $0x80] ss:$12 sps:$4 sm:$0xff]  }
  0x4b   :  { %329 = vmatpush1.bf16.msra.mxu0 %v3329_v6  ;;  %3134 = vmatprep.subr.bf16.mxu1 %v3685_v2  ;;  %p84_p13 = scmp.gt.s32.totalorder %s3791_s9, 0  ;;  %p2754_p0 = scmp.lt.s32.totalorder %s3791_s9, 63  ;;  %v3347_v21 = vld [vmem:[#allocation9 + $0x94] ss:$12 sps:$4 sm:$0xff]   ;;  %v3349_v22 = vld [vmem:[#allocation9 + $0x90] ss:$12 sps:$4 sm:$0xff]  }
  0x4c   :  { %330 = vmatprep.subr.bf16.mxu0 %v3331_v8  ;;  %s3810_s11 = sld [smem:[#allocation4 + $0x3]]  ;;  %v3350_v23 = vld [vmem:[#allocation9 + $0x98] ss:$12 sps:$4 sm:$0xff]   ;;  %s3812_s12 = sld [smem:[#allocation4 + $0x4]]  ;;  %v3353_v26 = vld [vmem:[#allocation9 + $0xa8] ss:$12 sps:$4 sm:$0xff]   ;;  %v183_v8 = vlaneseq }
  0x4d   :  { %s4266_s9 = smov (!%p84_p13, %s3791_s9), 0  ;;  %s3814_s13 = sld [smem:[#allocation4 + $0x5]]  ;;  %v3351_v24 = vld [vmem:[#allocation9 + $0xac] ss:$12 sps:$4 sm:$0xff]   ;;  %v3354_v27 = vld [vmem:[#allocation9 + $0xb0] ss:$12 sps:$4 sm:$0xff]  }
  0x4e   :  { %3135 = vmatpush3.bf16.msra.mxu1 %v3334_v10  ;;  %s4268_s9 = smov (!%p2754_p0, %s4266_s9), 63  ;;  %p92_p1 = scmp.gt.s32.totalorder %s3796_s3, 0  ;;  %v3826_v28 = vld [vmem:[#allocation11 + $0x4] ss:$12 sps:$4 sm:$0xff]   ;;  %v3844_v35 = vld [vmem:[#allocation11] ss:$12 sps:$4 sm:$0xff]  }
  0x4f   :  { %331 = vmatpush1.bf16.msra.mxu0 %v3333_v9  ;;  %3136 = vmatprep.subr.bf16.mxu1 %v3685_v2  ;;  %s88_s15 = scalar_lea.vmem [#allocation8], %s4268_s9  ;;  %p2760_p2 = scmp.lt.s32.totalorder %s3796_s3, 63  ;;  %v3376_v36 = vld [vmem:[#allocation11 + $0x8] ss:$12 sps:$4 sm:$0xff]   ;;  %v3848_v40 = vld [vmem:[#allocation11 + $0x18] ss:$12 sps:$4 sm:$0xff]  }
  0x50   :  { %332 = vmatprep.subr.bf16.mxu0 %v3335_v11  ;;  %v89_v19 = vld [vmem:[%s88_s15] sm:$0x1]  ;;  %s93_s16 = scalar_select %p92_p1, %s3796_s3, 0  ;;  %v3846_v37 = vld [vmem:[#allocation11 + $0x1c] ss:$12 sps:$4 sm:$0xff]   ;;  %v184_v9 = vshrl.u32 %v183_v8, 7 }
  0x51   :  { %90 = vst [vmem:[#allocation2] sm:$0x1] %v89_v19  ;;  %s3816_s14 = sld [smem:[#allocation4 + $0x6]]  ;;  %s3819_s0 = sld [smem:[#allocation4 + $0x7]]  ;;  %v3380_v41 = vld [vmem:[#allocation11 + $0x20] ss:$12 sps:$4 sm:$0xff]  }
  0x52   :  { %3137 = vmatpush3.bf16.msra.mxu1 %v3338_v13  ;;  %s4270_s16 = smov (!%p2760_p2, %s93_s16), 63  ;;  %p100_p3 = scmp.gt.s32.totalorder %s3807_s10, 0  ;;  %v3850_v42 = vld [vmem:[#allocation11 + $0x34] ss:$12 sps:$4 sm:$0xff]   ;;  %v3855_v43 = vld [vmem:[#allocation11 + $0x30] ss:$12 sps:$4 sm:$0xff]  }
  0x53   :  { %333 = vmatpush1.bf16.msra.mxu0 %v3337_v12  ;;  %3138 = vmatprep.subr.bf16.mxu1 %v3685_v2  ;;  %s96_s17 = scalar_lea.vmem [#allocation8], %s4270_s16  ;;  %p2766_p4 = scmp.lt.s32.totalorder %s3807_s10, 63  ;;  %v3381_v44 = vld [vmem:[#allocation11 + $0x38] ss:$12 sps:$4 sm:$0xff]   ;;  %v3865_v46 = vld [vmem:[#allocation11 + $0x48] ss:$12 sps:$4 sm:$0xff]  }
  0x54   :  { %334 = vmatprep.subr.bf16.mxu0 %v3339_v14  ;;  %v97_v25 = vld [vmem:[%s96_s17] sm:$0x1]  ;;  %p108_p5 = scmp.gt.s32.totalorder %s3810_s11, 0  ;;  %p2772_p6 = scmp.lt.s32.totalorder %s3810_s11, 63  ;;  %v3860_v45 = vld [vmem:[#allocation11 + $0x4c] ss:$12 sps:$4 sm:$0xff]  }
  0x55   :  { %98 = vst [vmem:[#allocation2 + $0x1] sm:$0x1] %v97_v25  ;;  %s4272_s10 = smov (!%p100_p3, %s3807_s10), 0  ;;  %p116_p7 = scmp.gt.s32.totalorder %s3812_s12, 0  ;;  %v3382_v47 = vld [vmem:[#allocation11 + $0x50] ss:$12 sps:$4 sm:$0xff]  }
  0x56   :  { %3139 = vmatpush3.bf16.msra.mxu1 %v3342_v16  ;;  %s4274_s11 = smov (!%p108_p5, %s3810_s11), 0  ;;  %s4276_s10 = smov (!%p2766_p4, %s4272_s10), 63  ;;  %v3867_v48 = vld [vmem:[#allocation11 + $0x64] ss:$12 sps:$4 sm:$0xff]   ;;  %v3872_v49 = vld [vmem:[#allocation11 + $0x60] ss:$12 sps:$4 sm:$0xff]  }
  0x57   :  { %335 = vmatpush1.bf16.msra.mxu0 %v3341_v15  ;;  %3140 = vmatprep.subr.bf16.mxu1 %v3685_v2  ;;  %s4278_s11 = smov (!%p2772_p6, %s4274_s11), 63  ;;  %s104_s18 = scalar_lea.vmem [#allocation8], %s4276_s10  ;;  %v3383_v50 = vld [vmem:[#allocation11 + $0x68] ss:$12 sps:$4 sm:$0xff]   ;;  %v3879_v52 = vld [vmem:[#allocation11 + $0x78] ss:$12 sps:$4 sm:$0xff]  }
  0x58   :  { %336 = vmatprep.subr.bf16.mxu0 %v3343_v17  ;;  %v105_v29 = vld [vmem:[%s104_s18] sm:$0x1]  ;;  %p2778_p8 = scmp.lt.s32.totalorder %s3812_s12, 63  ;;  %s112_s19 = scalar_lea.vmem [#allocation8], %s4278_s11  ;;  %v3874_v51 = vld [vmem:[#allocation11 + $0x7c] ss:$12 sps:$4 sm:$0xff]  }
  0x59   :  { %106 = vst [vmem:[#allocation2 + $0x2] sm:$0x1] %v105_v29  ;;  %v113_v30 = vld [vmem:[%s112_s19] sm:$0x1]  ;;  %s4280_s12 = smov (!%p116_p7, %s3812_s12), 0  ;;  %p124_p9 = scmp.gt.s32.totalorder %s3814_s13, 0 }
  0x5a   :  { %3141 = vmatpush3.bf16.msra.mxu1 %v3346_v20  ;;  %114 = vst [vmem:[#allocation2 + $0x3] sm:$0x1] %v113_v30  ;;  %p2784_p10 = scmp.lt.s32.totalorder %s3814_s13, 63  ;;  %s4282_s12 = smov (!%p2778_p8, %s4280_s12), 63  ;;  %v3384_v53 = vld [vmem:[#allocation11 + $0x80] ss:$12 sps:$4 sm:$0xff]  }
  0x5b   :  { %337 = vmatpush1.bf16.msra.mxu0 %v3345_v18  ;;  %3142 = vmatprep.subr.bf16.mxu1 %v3685_v2  ;;  %s4284_s13 = smov (!%p124_p9, %s3814_s13), 0  ;;  %p132_p11 = scmp.gt.s32.totalorder %s3816_s14, 0  ;;  %v3881_v54 = vld [vmem:[#allocation11 + $0x94] ss:$12 sps:$4 sm:$0xff]   ;;  %v3886_v55 = vld [vmem:[#allocation11 + $0x90] ss:$12 sps:$4 sm:$0xff]  }
  0x5c   :  { %338 = vmatprep.subr.bf16.mxu0 %v3347_v21  ;;  %s120_s20 = scalar_lea.vmem [#allocation8], %s4282_s12  ;;  %s4286_s13 = smov (!%p2784_p10, %s4284_s13), 63  ;;  %v3385_v56 = vld [vmem:[#allocation11 + $0x98] ss:$12 sps:$4 sm:$0xff]   ;;  %v3893_v58 = vld [vmem:[#allocation11 + $0xa8] ss:$12 sps:$4 sm:$0xff]  }
  0x5d   :  { %v121_v31 = vld [vmem:[%s120_s20] sm:$0x1]  ;;  %s133_s21 = scalar_select %p132_p11, %s3816_s14, 0  ;;  %v3888_v57 = vld [vmem:[#allocation11 + $0xac] ss:$12 sps:$4 sm:$0xff]   ;;  %v3935_v10 = vsub.s32 0, %v184_v9 }
  0x5e   :  { %3143 = vmatpush3.bf16.msra.mxu1 %v3350_v23  ;;  %122 = vst [vmem:[#allocation2 + $0x4] sm:$0x1] %v121_v31  ;;  %p2790_p12 = scmp.lt.s32.totalorder %s3816_s14, 63  ;;  %s128_s22 = scalar_lea.vmem [#allocation8], %s4286_s13  ;;  %v3898_v59 = vld [vmem:[%s4262_s6] sm:$0x1] }
  0x5f   :  { %339 = vmatpush1.bf16.msra.mxu0 %v3349_v22  ;;  %3144 = vmatprep.subr.bf16.mxu1 %v3685_v2  ;;  %v129_v32 = vld [vmem:[%s128_s22] sm:$0x1]  ;;  %p140_p13 = scmp.gt.s32.totalorder %s3819_s0, 0  ;;  %p2796_p0 = scmp.lt.s32.totalorder %s3819_s0, 63  ;;  %v412_v61 = vpack.c.bf16 %v3898_v59, %v3898_v59  ;;  %v3387_v62 = vld [vmem:[#allocation11 + $0x8] ss:$12 sps:$4 sm:$0xff]  }
  0x60   :  { %340 = vmatprep.subr.bf16.mxu0 %v3351_v24  ;;  %130 = vst [vmem:[#allocation2 + $0x5] sm:$0x1] %v129_v32  ;;  %s4288_s21 = smov (!%p2790_p12, %s133_s21), 63  ;;  %v3386_v60 = vld [vmem:[#allocation11 + $0xb0] ss:$12 sps:$4 sm:$0xff]   ;;  %v3937_v11 = vsub.s32 2, %v184_v9 }
  0x61   :  { %s4290_s0 = smov (!%p140_p13, %s3819_s0), 0  ;;  %s136_s23 = scalar_lea.vmem [#allocation8], %s4288_s21  ;;  %v3388_v63 = vld [vmem:[#allocation11 + $0x20] ss:$12 sps:$4 sm:$0xff]   ;;  %v3389_v0 = vld [vmem:[#allocation11 + $0x38] ss:$12 sps:$4 sm:$0xff]  }
  0x62   :  { %3145 = vmatpush3.bf16.msra.mxu1 %v3354_v27  ;;  %v137_v33 = vld [vmem:[%s136_s23] sm:$0x1]  ;;  %s4292_s0 = smov (!%p2796_p0, %s4290_s0), 63  ;;  %v3391_v4 = vld [vmem:[#allocation11 + $0x68] ss:$12 sps:$4 sm:$0xff]   ;;  %v3942_v13 = vsub.s32 1, %v184_v9 }
  0x63   :  { %341 = vmatpush1.bf16.msra.mxu0 %v3353_v26  ;;  %3150 = vmatprep.subr.bf16.mxu1 %v3685_v2  ;;  %138 = vst [vmem:[#allocation2 + $0x6] sm:$0x1] %v137_v33  ;;  %s144_s24 = scalar_lea.vmem [#allocation8], %s4292_s0  ;;  %v3390_v1 = vld [vmem:[#allocation11 + $0x50] ss:$12 sps:$4 sm:$0xff]   ;;  %s3689_s18 = smov [#allocation13]  }
  0x64   :  { %590 = vmatprep.subr.bf16.mxu0 %v3826_v28  ;;  %v145_v34 = vld [vmem:[%s144_s24] sm:$0x1]  ;;  %v3392_v5 = vld [vmem:[#allocation11 + $0x80] ss:$12 sps:$4 sm:$0xff]   ;;  %v3393_v6 = vld [vmem:[#allocation11 + $0x98] ss:$12 sps:$4 sm:$0xff]  }
  0x65   :  { %146 = vst [vmem:[#allocation2 + $0x7] sm:$0x1] %v145_v34  ;;  %v3394_v7 = vld [vmem:[#allocation11 + $0xb0] ss:$12 sps:$4 sm:$0xff]   ;;  %s2731_s19 = sshll.u32 %s3689_s18, 4  ;;  %s4224_s19 = int_to_ptr.vmem [resolvable:$true] %s2731_s19 }
  0x66   :  { %v181_v12 = vld [vmem:[%s4260_s4] sm:$0x7] }
  0x67   :  { %v186_v14 = vrot.slane %v181_v12, %v3935_v10  ;;  %v194_v15 = vrot.slane %v181_v12, %v3937_v11  ;;  %v190_v16 = vrot.slane %v181_v12, %v3942_v13  ;;  %v445_v29 = vld [vmem:[%s4261_s5] sm:$0x7] }
  0x68   :  { %v578_v30 = vrot.slane %v445_v29, %v3935_v10  ;;  %v582_v31 = vrot.slane %v445_v29, %v3942_v13 }
  0x6c   :  { %v147_v38 = vld [vmem:[#allocation2] sm:$0xff] }
  0x6d   :  { %v148_v39 = vpack.c.bf16 %v147_v38, %v147_v38 }
  0x6f   :  { %359 = vmatmul.mubr.bf16.vlgmr.msra.gmra.mrb[0].mxu0 %v148_v39  ;;  %3147 = vmatmul.mubr.bf16.vlgmr.msra.gmra.mrb[0].mxu1 %v148_v39 }
  0x70   :  { %591 = vmatpush1.bf16.msra.mxu0 %v3844_v35  ;;  %3151 = vmatpush3.bf16.msra.mxu1 %v3376_v36 }
  0x71   :  { %592 = vmatprep.subr.bf16.mxu0 %v3846_v37  ;;  %3152 = vmatprep.subr.bf16.mxu1 %v3685_v2 }
  0x72   :  { %622 = vmatprep.mubr.bf16.mxu0 %v3686_v3  ;;  %3166 = vmatprep.mubr.msk.bf16.mxu1 %vm3687_vm0, %v3685_v2 }
  0x74   :  { %593 = vmatpush1.bf16.msra.mxu0 %v3848_v40  ;;  %3153 = vmatpush3.bf16.msra.mxu1 %v3380_v41 }
  0x75   :  { %594 = vmatprep.subr.bf16.mxu0 %v3850_v42  ;;  %3154 = vmatprep.subr.bf16.mxu1 %v3685_v2 }
  0x78   :  { %595 = vmatpush1.bf16.msra.mxu0 %v3855_v43  ;;  %3155 = vmatpush3.bf16.msra.mxu1 %v3381_v44 }
  0x79   :  { %596 = vmatprep.subr.bf16.mxu0 %v3860_v45  ;;  %3156 = vmatprep.subr.bf16.mxu1 %v3685_v2 }
  0x7c   :  { %597 = vmatpush1.bf16.msra.mxu0 %v3865_v46  ;;  %3157 = vmatpush3.bf16.msra.mxu1 %v3382_v47 }
  0x7d   :  { %598 = vmatprep.subr.bf16.mxu0 %v3867_v48  ;;  %3158 = vmatprep.subr.bf16.mxu1 %v3685_v2 }
  0x80   :  { %599 = vmatpush1.bf16.msra.mxu0 %v3872_v49  ;;  %3159 = vmatpush3.bf16.msra.mxu1 %v3383_v50 }
  0x81   :  { %600 = vmatprep.subr.bf16.mxu0 %v3874_v51  ;;  %3160 = vmatprep.subr.bf16.mxu1 %v3685_v2 }
  0x84   :  { %601 = vmatpush1.bf16.msra.mxu0 %v3879_v52  ;;  %3161 = vmatpush3.bf16.msra.mxu1 %v3384_v53 }
  0x85   :  { %602 = vmatprep.subr.bf16.mxu0 %v3881_v54  ;;  %3162 = vmatprep.subr.bf16.mxu1 %v3685_v2 }
  0x88   :  { %603 = vmatpush1.bf16.msra.mxu0 %v3886_v55  ;;  %3163 = vmatpush3.bf16.msra.mxu1 %v3385_v56 }
  0x89   :  { %604 = vmatprep.subr.bf16.mxu0 %v3888_v57  ;;  %3164 = vmatprep.subr.bf16.mxu1 %v3685_v2 }
  0x8c   :  { %605 = vmatpush1.bf16.msra.mxu0 %v3893_v58  ;;  %3165 = vmatpush3.bf16.msra.mxu1 %v3386_v60 }
  0x8d   :  { %878 = vmatprep.subr.bf16.mxu0 %v3826_v28  ;;  %3170 = vmatprep.subr.bf16.mxu1 %v3685_v2 }
  0x8f   :  { %623 = vmatmul.mubr.bf16.vlgmr.msra.gmra.mrb[4].mxu0 %v412_v61  ;;  %3167 = vmatmul.mubr.bf16.vlgmr.msra.gmra.mrb[4].mxu1 %v412_v61 }
  0x90   :  { %879 = vmatpush1.bf16.msra.mxu0 %v3844_v35  ;;  %910 = vmatprep.mubr.bf16.mxu0 %v3686_v3 }
  0x91   :  { %880 = vmatprep.subr.bf16.mxu0 %v3846_v37  ;;  %3186 = vmatprep.mubr.msk.bf16.mxu1 %vm3687_vm0, %v3685_v2 }
  0x92   :  { %3171 = vmatpush3.bf16.msra.mxu1 %v3387_v62 }
  0x93   :  { %3172 = vmatprep.subr.bf16.mxu1 %v3685_v2 }
  0x94   :  { %881 = vmatpush1.bf16.msra.mxu0 %v3848_v40 }
  0x95   :  { %882 = vmatprep.subr.bf16.mxu0 %v3850_v42 }
  0x96   :  { %3173 = vmatpush3.bf16.msra.mxu1 %v3388_v63 }
  0x97   :  { %3174 = vmatprep.subr.bf16.mxu1 %v3685_v2 }
  0x98   :  { %883 = vmatpush1.bf16.msra.mxu0 %v3855_v43 }
  0x99   :  { %884 = vmatprep.subr.bf16.mxu0 %v3860_v45 }
  0x9a   :  { %3175 = vmatpush3.bf16.msra.mxu1 %v3389_v0 }
  0x9b   :  { %3176 = vmatprep.subr.bf16.mxu1 %v3685_v2 }
  0x9c   :  { %885 = vmatpush1.bf16.msra.mxu0 %v3865_v46 }
  0x9d   :  { %886 = vmatprep.subr.bf16.mxu0 %v3867_v48 }
  0x9e   :  { %3177 = vmatpush3.bf16.msra.mxu1 %v3390_v1 }
  0x9f   :  { %3178 = vmatprep.subr.bf16.mxu1 %v3685_v2 }
  0xa0   :  { %887 = vmatpush1.bf16.msra.mxu0 %v3872_v49 }
  0xa1   :  { %888 = vmatprep.subr.bf16.mxu0 %v3874_v51 }
  0xa2   :  { %3179 = vmatpush3.bf16.msra.mxu1 %v3391_v4  ;;  %v586_v4 = vrot.slane %v445_v29, %v3937_v11  ;;  %v733_v29 = vld [vmem:[%s4261_s5] sm:$0x7] }
  0xa3   :  { %3180 = vmatprep.subr.bf16.mxu1 %v3685_v2 }
  0xa4   :  { %889 = vmatpush1.bf16.msra.mxu0 %v3879_v52 }
  0xa5   :  { %890 = vmatprep.subr.bf16.mxu0 %v3881_v54 }
  0xa6   :  { %3181 = vmatpush3.bf16.msra.mxu1 %v3392_v5 }
  0xa7   :  { %3182 = vmatprep.subr.bf16.mxu1 %v3685_v2 }
  0xa8   :  { %891 = vmatpush1.bf16.msra.mxu0 %v3886_v55 }
  0xa9   :  { %892 = vmatprep.subr.bf16.mxu0 %v3888_v57 }
  0xaa   :  { %3183 = vmatpush3.bf16.msra.mxu1 %v3393_v6 }
  0xab   :  { %3184 = vmatprep.subr.bf16.mxu1 %v3685_v2 }
  0xac   :  { %893 = vmatpush1.bf16.msra.mxu0 %v3893_v58 }
  0xad   :  { %1166 = vmatprep.subr.bf16.mxu0 %v3826_v28 }
  0xae   :  { %3185 = vmatpush3.bf16.msra.mxu1 %v3394_v7 }
  0xaf   :  { %3190 = vmatprep.subr.bf16.mxu1 %v3685_v2 }
 0x142   :  { %v360_v17 = vpop.f32.mrb[0].mxu0  ;;  %v401_v18 = vpop.f32.mrb[0].mxu1 }
 0x143   :  { %v361_v19 = vadd.f32 %v360_v17, %v186_v14  ;;  %v362_v20 = vpop.f32.mrb[1].mxu0  ;;  %v402_v21 = vadd.f32 %v401_v18, %v194_v15  ;;  %v3148_v22 = vpop.f32.mrb[1].mxu1 }
 0x144   :  { %v363_v23 = vadd.f32 %v362_v20, %v190_v16  ;;  %v364_v24 = vpop.f32.mrb[2].mxu0  ;;  %v404_v25 = vpop.f32.mrb[2].mxu1  ;;  %v3396_v22 = vld [vmem:[#allocation11 + $0x20] ss:$12 sps:$4 sm:$0xff]  }
 0x145   :  { %407 = vst [vmem:[#allocation3] sm:$0xff] %v361_v19  ;;  %409 = vst [vmem:[#allocation3 + $0x10] sm:$0xff] %v402_v21  ;;  %v365_v26 = vpop.f32.mrb[3].mxu0  ;;  %v3149_v27 = vpop.f32.mrb[3].mxu1  ;;  %v3398_v24 = vld [vmem:[#allocation11 + $0x50] ss:$12 sps:$4 sm:$0xff]  }
 0x146   :  { %408 = vst [vmem:[#allocation3 + $0x8] sm:$0xff] %v363_v23  ;;  %v3397_v23 = vld [vmem:[#allocation11 + $0x38] ss:$12 sps:$4 sm:$0xff]   ;;  %v3399_v25 = vld [vmem:[#allocation11 + $0x68] ss:$12 sps:$4 sm:$0xff]  }
 0x147   :  { %v3400_v26 = vld [vmem:[#allocation11 + $0x80] ss:$12 sps:$4 sm:$0xff]   ;;  %v3402_v27 = vld [vmem:[#allocation11 + $0xb0] ss:$12 sps:$4 sm:$0xff]  }
 0x14d   :  { %v411_v34 = vld [vmem:[#allocation3] ss:$8 sm:$0x7] }
 0x14e   :  { %v679_v60 = vrot.slane %v411_v34, 1  ;;  %v689_v12 = vrot.slane %v411_v34, 2 }
 0x162   :  { %v624_v32 = vpop.f32.mrb[4].mxu0  ;;  %v665_v33 = vpop.f32.mrb[4].mxu1 }
 0x163   :  { %v625_v36 = vadd.f32 %v624_v32, %v578_v30  ;;  %v626_v38 = vpop.f32.mrb[5].mxu0  ;;  %v3168_v39 = vpop.f32.mrb[5].mxu1  ;;  %v666_v7 = vadd.f32 %v665_v33, %v586_v4  ;;  %v866_v30 = vrot.slane %v733_v29, %v3935_v10 }
 0x164   :  { %v627_v41 = vadd.f32 %v626_v38, %v582_v31  ;;  %v628_v44 = vpop.f32.mrb[6].mxu0  ;;  %v668_v47 = vpop.f32.mrb[6].mxu1  ;;  %v870_v31 = vrot.slane %v733_v29, %v3942_v13 }
 0x165   :  { %v671_v50 = vadd.f32 %v625_v36, %v411_v34  ;;  %v629_v53 = vpop.f32.mrb[7].mxu0  ;;  %v3169_v56 = vpop.f32.mrb[7].mxu1  ;;  %v699_v34 = vld [vmem:[#allocation3 + $0x1] ss:$8 sm:$0x7] }
 0x166   :  { %v681_v62 = vadd.f32 %v679_v60, %v627_v41  ;;  %v967_v60 = vrot.slane %v699_v34, 1 }
 0x167   :  { %v2849_v61 = vmul.f32 -1.442695, %v671_v50 }
 0x168   :  { %v2850_v63 = vmul.f32 -1.442695, %v681_v62 }
 0x169   :  { %3467 = vpow2.f32 %v2849_v61 }
 0x16a   :  { %3469 = vpow2.f32 %v2850_v63 }
 0x173   :  { %v3468_v0 = vpop.eup %3467 }
 0x174   :  { %v675_v1 = vadd.f32 1.0, %v3468_v0  ;;  %v3470_v5 = vpop.eup %3469 }
 0x175   :  { %v685_v6 = vadd.f32 1.0, %v3470_v5  ;;  %v874_v5 = vrot.slane %v733_v29, %v3937_v11 }
 0x176   :  { %3471 = vrcp.f32 %v675_v1 }
 0x177   :  { %3473 = vrcp.f32 %v685_v6 }
 0x180   :  { %v3472_v8 = vpop.eup %3471 }
 0x181   :  { %v688_v9 = vmul.f32 %v3472_v8, %v666_v7  ;;  %v3474_v15 = vpop.eup %3473 }
 0x182   :  { %v693_v16 = vsub.f32 1.0, %v3474_v15  ;;  %v695_v19 = vmul.f32 %v3474_v15, %v3898_v59  ;;  %v3395_v59 = vld [vmem:[#allocation11 + $0x8] ss:$12 sps:$4 sm:$0xff]  }
 0x183   :  { %v691_v14 = vadd.f32 %v689_v12, %v688_v9  ;;  %v977_v12 = vrot.slane %v699_v34, 2 }
 0x185   :  { %3475 = vtanh.f32 %v691_v14 }
 0x18f   :  { %v3476_v17 = vpop.eup %3475 }
 0x190   :  { %v694_v18 = vmul.f32 %v3476_v17, %v693_v16 }
 0x192   :  { %v3954_v20 = vadd.f32 %v695_v19, %v694_v18 }
 0x194   :  { %697 = vst [vmem:[#allocation12] sm:$0x1] %v3954_v20  ;;  %v700_v21 = vpack.c.bf16 %v3954_v20, %v3954_v20 }
 0x196   :  { %911 = vmatmul.mubr.bf16.vlgmr.msra.gmra.mrb[8].mxu0 %v700_v21  ;;  %3187 = vmatmul.mubr.bf16.vlgmr.msra.gmra.mrb[8].mxu1 %v700_v21 }
 0x197   :  { %1167 = vmatpush1.bf16.msra.mxu0 %v3844_v35  ;;  %1198 = vmatprep.mubr.bf16.mxu0 %v3686_v3 }
 0x198   :  { %1168 = vmatprep.subr.bf16.mxu0 %v3846_v37  ;;  %3206 = vmatprep.mubr.msk.bf16.mxu1 %vm3687_vm0, %v3685_v2 }
 0x199   :  { %3191 = vmatpush3.bf16.msra.mxu1 %v3395_v59 }
 0x19a   :  { %3192 = vmatprep.subr.bf16.mxu1 %v3685_v2 }
 0x19b   :  { %1169 = vmatpush1.bf16.msra.mxu0 %v3848_v40 }
 0x19c   :  { %1170 = vmatprep.subr.bf16.mxu0 %v3850_v42 }
 0x19d   :  { %3193 = vmatpush3.bf16.msra.mxu1 %v3396_v22 }
 0x19e   :  { %3194 = vmatprep.subr.bf16.mxu1 %v3685_v2 }
 0x19f   :  { %1171 = vmatpush1.bf16.msra.mxu0 %v3855_v43 }
 0x1a0   :  { %1172 = vmatprep.subr.bf16.mxu0 %v3860_v45 }
 0x1a1   :  { %3195 = vmatpush3.bf16.msra.mxu1 %v3397_v23 }
 0x1a2   :  { %3196 = vmatprep.subr.bf16.mxu1 %v3685_v2 }
 0x1a3   :  { %1173 = vmatpush1.bf16.msra.mxu0 %v3865_v46 }
 0x1a4   :  { %1174 = vmatprep.subr.bf16.mxu0 %v3867_v48 }
 0x1a5   :  { %3197 = vmatpush3.bf16.msra.mxu1 %v3398_v24 }
 0x1a6   :  { %3198 = vmatprep.subr.bf16.mxu1 %v3685_v2 }
 0x1a7   :  { %1175 = vmatpush1.bf16.msra.mxu0 %v3872_v49 }
 0x1a8   :  { %1176 = vmatprep.subr.bf16.mxu0 %v3874_v51 }
 0x1a9   :  { %3199 = vmatpush3.bf16.msra.mxu1 %v3399_v25 }
 0x1aa   :  { %3200 = vmatprep.subr.bf16.mxu1 %v3685_v2 }
 0x1ab   :  { %1177 = vmatpush1.bf16.msra.mxu0 %v3879_v52 }
 0x1ac   :  { %1178 = vmatprep.subr.bf16.mxu0 %v3881_v54 }
 0x1ad   :  { %3201 = vmatpush3.bf16.msra.mxu1 %v3400_v26 }
 0x1ae   :  { %3202 = vmatprep.subr.bf16.mxu1 %v3685_v2 }
 0x1af   :  { %1179 = vmatpush1.bf16.msra.mxu0 %v3886_v55 }
 0x1b0   :  { %1180 = vmatprep.subr.bf16.mxu0 %v3888_v57 }
 0x1b3   :  { %1181 = vmatpush1.bf16.msra.mxu0 %v3893_v58 }
 0x1b4   :  { %1454 = vmatprep.subr.bf16.mxu0 %v3826_v28  ;;  %v3401_v28 = vld [vmem:[#allocation11 + $0x98] ss:$12 sps:$4 sm:$0xff]  }
 0x1b5   :  { %3203 = vmatpush3.bf16.msra.mxu1 %v3401_v28 }
 0x1b6   :  { %3204 = vmatprep.subr.bf16.mxu1 %v3685_v2 }
 0x1b9   :  { %3205 = vmatpush3.bf16.msra.mxu1 %v3402_v27 }
 0x1ba   :  { %3210 = vmatprep.subr.bf16.mxu1 %v3685_v2 }
 0x269   :  { %v912_v32 = vpop.f32.mrb[8].mxu0  ;;  %v953_v33 = vpop.f32.mrb[8].mxu1 }
 0x26a   :  { %v913_v36 = vadd.f32 %v912_v32, %v866_v30  ;;  %v914_v38 = vpop.f32.mrb[9].mxu0  ;;  %v3188_v39 = vpop.f32.mrb[9].mxu1  ;;  %v954_v7 = vadd.f32 %v953_v33, %v874_v5  ;;  %v4041_v5 = vld [vmem:[#allocation11] ss:$12 sps:$4 sm:$0xff]  }
 0x26b   :  { %v915_v41 = vadd.f32 %v914_v38, %v870_v31  ;;  %v916_v44 = vpop.f32.mrb[10].mxu0  ;;  %v956_v47 = vpop.f32.mrb[10].mxu1 }
 0x26c   :  { %v959_v50 = vadd.f32 %v913_v36, %v699_v34  ;;  %v917_v53 = vpop.f32.mrb[11].mxu0  ;;  %v3189_v56 = vpop.f32.mrb[11].mxu1 }
 0x26d   :  { %v969_v62 = vadd.f32 %v967_v60, %v915_v41 }
 0x26e   :  { %v2875_v61 = vmul.f32 -1.442695, %v959_v50 }
 0x26f   :  { %v2876_v63 = vmul.f32 -1.442695, %v969_v62 }
 0x270   :  { %3477 = vpow2.f32 %v2875_v61 }
 0x271   :  { %3479 = vpow2.f32 %v2876_v63 }
 0x27a   :  { %v3478_v0 = vpop.eup %3477 }
 0x27b   :  { %v963_v1 = vadd.f32 1.0, %v3478_v0  ;;  %v3480_v4 = vpop.eup %3479 }
 0x27c   :  { %v973_v6 = vadd.f32 1.0, %v3480_v4  ;;  %v4039_v4 = vld [vmem:[#allocation11 + $0x4] ss:$12 sps:$4 sm:$0xff]  }
 0x27d   :  { %3481 = vrcp.f32 %v963_v1 }
 0x27e   :  { %3483 = vrcp.f32 %v973_v6  ;;  %v3414_v6 = vld [vmem:[#allocation11 + $0x8] ss:$12 sps:$4 sm:$0xff]  }
 0x287   :  { %v3482_v8 = vpop.eup %3481 }
 0x288   :  { %v976_v9 = vmul.f32 %v3482_v8, %v954_v7  ;;  %v3484_v15 = vpop.eup %3483  ;;  %v4045_v7 = vld [vmem:[#allocation11 + $0x1c] ss:$12 sps:$4 sm:$0xff]   ;;  %v4048_v8 = vld [vmem:[#allocation11 + $0x18] ss:$12 sps:$4 sm:$0xff]  }
 0x289   :  { %v981_v16 = vsub.f32 1.0, %v3484_v15  ;;  %v983_v19 = vmul.f32 %v3484_v15, %v3954_v20  ;;  %v3422_v15 = vld [vmem:[#allocation11 + $0x38] ss:$12 sps:$4 sm:$0xff]  }
 0x28a   :  { %v979_v14 = vadd.f32 %v977_v12, %v976_v9  ;;  %v3418_v9 = vld [vmem:[#allocation11 + $0x20] ss:$12 sps:$4 sm:$0xff]  }
 0x28b   :  { %v4052_v12 = vld [vmem:[#allocation11 + $0x34] ss:$12 sps:$4 sm:$0xff]  }
 0x28c   :  { %3485 = vtanh.f32 %v979_v14  ;;  %v4055_v14 = vld [vmem:[#allocation11 + $0x30] ss:$12 sps:$4 sm:$0xff]  }
 0x296   :  { %v3486_v17 = vpop.eup %3485 }
 0x297   :  { %v982_v18 = vmul.f32 %v3486_v17, %v981_v16  ;;  %v4059_v16 = vld [vmem:[#allocation11 + $0x4c] ss:$12 sps:$4 sm:$0xff]   ;;  %v4062_v17 = vld [vmem:[#allocation11 + $0x48] ss:$12 sps:$4 sm:$0xff]  }
 0x299   :  { %v3993_v21 = vadd.f32 %v983_v19, %v982_v18  ;;  %v3426_v18 = vld [vmem:[#allocation11 + $0x50] ss:$12 sps:$4 sm:$0xff]   ;;  %v4066_v19 = vld [vmem:[#allocation11 + $0x60] ss:$12 sps:$4 sm:$0xff]  }
 0x29b   :  { %985 = vst [vmem:[#allocation12 + $0x1] sm:$0x1] %v3993_v21  ;;  %v988_v59 = vpack.c.bf16 %v3993_v21, %v3993_v21 }
 0x29d   :  { %1199 = vmatmul.mubr.bf16.vlgmr.msra.gmra.mrb[12].mxu0 %v988_v59  ;;  %3207 = vmatmul.mubr.bf16.vlgmr.msra.gmra.mrb[12].mxu1 %v988_v59  ;;  %v3430_v59 = vld [vmem:[#allocation11 + $0x68] ss:$12 sps:$4 sm:$0xff]  }
 0x29e   :  { %1455 = vmatpush1.bf16.msra.mxu0 %v3844_v35  ;;  %1486 = vmatprep.mubr.bf16.mxu0 %v3686_v3  ;;  %v3403_v35 = vld [vmem:[#allocation11 + $0x8] ss:$12 sps:$4 sm:$0xff]  }
 0x29f   :  { %1456 = vmatprep.subr.bf16.mxu0 %v3846_v37  ;;  %3226 = vmatprep.mubr.msk.bf16.mxu1 %vm3687_vm0, %v3685_v2  ;;  %v3404_v37 = vld [vmem:[#allocation11 + $0x20] ss:$12 sps:$4 sm:$0xff]  }
 0x2a0   :  { %3211 = vmatpush3.bf16.msra.mxu1 %v3403_v35  ;;  %v4071_v35 = vld [vmem:[#allocation11 + $0x7c] ss:$12 sps:$4 sm:$0xff]  }
 0x2a1   :  { %3212 = vmatprep.subr.bf16.mxu1 %v3685_v2 }
 0x2a2   :  { %1457 = vmatpush1.bf16.msra.mxu0 %v3848_v40  ;;  %v3405_v40 = vld [vmem:[#allocation11 + $0x38] ss:$12 sps:$4 sm:$0xff]  }
 0x2a3   :  { %1458 = vmatprep.subr.bf16.mxu0 %v3850_v42  ;;  %v3406_v42 = vld [vmem:[#allocation11 + $0x50] ss:$12 sps:$4 sm:$0xff]  }
 0x2a4   :  { %3213 = vmatpush3.bf16.msra.mxu1 %v3404_v37  ;;  %v4075_v37 = vld [vmem:[#allocation11 + $0x78] ss:$12 sps:$4 sm:$0xff]  }
 0x2a5   :  { %3214 = vmatprep.subr.bf16.mxu1 %v3685_v2 }
 0x2a6   :  { %1459 = vmatpush1.bf16.msra.mxu0 %v3855_v43  ;;  %v3407_v43 = vld [vmem:[#allocation11 + $0x68] ss:$12 sps:$4 sm:$0xff]  }
 0x2a7   :  { %1460 = vmatprep.subr.bf16.mxu0 %v3860_v45  ;;  %v3408_v45 = vld [vmem:[#allocation11 + $0x80] ss:$12 sps:$4 sm:$0xff]  }
 0x2a8   :  { %3215 = vmatpush3.bf16.msra.mxu1 %v3405_v40  ;;  %v3434_v40 = vld [vmem:[#allocation11 + $0x80] ss:$12 sps:$4 sm:$0xff]  }
 0x2a9   :  { %3216 = vmatprep.subr.bf16.mxu1 %v3685_v2 }
 0x2aa   :  { %1461 = vmatpush1.bf16.msra.mxu0 %v3865_v46  ;;  %v3409_v46 = vld [vmem:[#allocation11 + $0x98] ss:$12 sps:$4 sm:$0xff]  }
 0x2ab   :  { %1462 = vmatprep.subr.bf16.mxu0 %v3867_v48  ;;  %v3410_v48 = vld [vmem:[#allocation11 + $0xb0] ss:$12 sps:$4 sm:$0xff]  }
 0x2ac   :  { %3217 = vmatpush3.bf16.msra.mxu1 %v3406_v42  ;;  %v4079_v42 = vld [vmem:[#allocation11 + $0x94] ss:$12 sps:$4 sm:$0xff]  }
 0x2ad   :  { %3218 = vmatprep.subr.bf16.mxu1 %v3685_v2 }
 0x2ae   :  { %1463 = vmatpush1.bf16.msra.mxu0 %v3872_v49  ;;  %v1021_v49 = vld [vmem:[%s4261_s5] sm:$0x7] }
 0x2af   :  { %1464 = vmatprep.subr.bf16.mxu0 %v3874_v51  ;;  %v1154_v51 = vrot.slane %v1021_v49, %v3935_v10  ;;  %v1162_v38 = vrot.slane %v1021_v49, %v3937_v11 }
 0x2b0   :  { %3219 = vmatpush3.bf16.msra.mxu1 %v3407_v43  ;;  %v4082_v43 = vld [vmem:[#allocation11 + $0x90] ss:$12 sps:$4 sm:$0xff]  }
 0x2b1   :  { %3220 = vmatprep.subr.bf16.mxu1 %v3685_v2 }
 0x2b2   :  { %1465 = vmatpush1.bf16.msra.mxu0 %v3879_v52  ;;  %v1158_v52 = vrot.slane %v1021_v49, %v3942_v13  ;;  %v3442_v49 = vld [vmem:[#allocation11 + $0xb0] ss:$12 sps:$4 sm:$0xff]  }
 0x2b3   :  { %1466 = vmatprep.subr.bf16.mxu0 %v3881_v54 }
 0x2b4   :  { %3221 = vmatpush3.bf16.msra.mxu1 %v3408_v45  ;;  %v3438_v45 = vld [vmem:[#allocation11 + $0x98] ss:$12 sps:$4 sm:$0xff]  }
 0x2b5   :  { %3222 = vmatprep.subr.bf16.mxu1 %v3685_v2 }
 0x2b6   :  { %1467 = vmatpush1.bf16.msra.mxu0 %v3886_v55 }
 0x2b7   :  { %1468 = vmatprep.subr.bf16.mxu0 %v3888_v57  ;;  %v987_v57 = vld [vmem:[#allocation3 + $0x2] ss:$8 sm:$0x7] }
 0x2b8   :  { %3223 = vmatpush3.bf16.msra.mxu1 %v3409_v46  ;;  %v1255_v29 = vrot.slane %v987_v57, 1  ;;  %v1265_v50 = vrot.slane %v987_v57, 2  ;;  %v4086_v46 = vld [vmem:[#allocation11 + $0xac] ss:$12 sps:$4 sm:$0xff]  }
 0x2b9   :  { %3224 = vmatprep.subr.bf16.mxu1 %v3685_v2 }
 0x2ba   :  { %1469 = vmatpush1.bf16.msra.mxu0 %v3893_v58 }
 0x2bb   :  { %1742 = vmatprep.subr.bf16.mxu0 %v4039_v4 }
 0x2bc   :  { %3225 = vmatpush3.bf16.msra.mxu1 %v3410_v48  ;;  %v4089_v48 = vld [vmem:[#allocation11 + $0xa8] ss:$12 sps:$4 sm:$0xff]  }
 0x2bd   :  { %3230 = vmatprep.subr.bf16.mxu1 %v3685_v2 }
 0x370   :  { %v1200_v54 = vpop.f32.mrb[12].mxu0  ;;  %v1241_v55 = vpop.f32.mrb[12].mxu1 }
 0x371   :  { %v1201_v58 = vadd.f32 %v1200_v54, %v1154_v51  ;;  %v1202_v20 = vpop.f32.mrb[13].mxu0  ;;  %v3208_v22 = vpop.f32.mrb[13].mxu1  ;;  %v1242_v41 = vadd.f32 %v1241_v55, %v1162_v38  ;;  %v1309_v51 = vld [vmem:[%s4261_s5] sm:$0x7] }
 0x372   :  { %v1203_v23 = vadd.f32 %v1202_v20, %v1158_v52  ;;  %v1204_v24 = vpop.f32.mrb[14].mxu0  ;;  %v1244_v25 = vpop.f32.mrb[14].mxu1  ;;  %v1442_v52 = vrot.slane %v1309_v51, %v3935_v10  ;;  %v1446_v54 = vrot.slane %v1309_v51, %v3942_v13 }
 0x373   :  { %v1247_v26 = vadd.f32 %v1201_v58, %v987_v57  ;;  %v1205_v28 = vpop.f32.mrb[15].mxu0  ;;  %v3209_v27 = vpop.f32.mrb[15].mxu1  ;;  %v1275_v58 = vld [vmem:[#allocation3 + $0x3] ss:$8 sm:$0x7] }
 0x374   :  { %v1257_v31 = vadd.f32 %v1255_v29, %v1203_v23 }
 0x375   :  { %v2901_v30 = vmul.f32 -1.442695, %v1247_v26 }
 0x376   :  { %v2902_v32 = vmul.f32 -1.442695, %v1257_v31 }
 0x377   :  { %3487 = vpow2.f32 %v2901_v30  ;;  %v1543_v30 = vrot.slane %v1275_v58, 1 }
 0x378   :  { %3489 = vpow2.f32 %v2902_v32 }
 0x381   :  { %v3488_v33 = vpop.eup %3487 }
 0x382   :  { %v1251_v34 = vadd.f32 1.0, %v3488_v33  ;;  %v3490_v36 = vpop.eup %3489 }
 0x383   :  { %v1261_v39 = vadd.f32 1.0, %v3490_v36 }
 0x384   :  { %3491 = vrcp.f32 %v1251_v34 }
 0x385   :  { %3493 = vrcp.f32 %v1261_v39  ;;  %v1450_v39 = vrot.slane %v1309_v51, %v3937_v11  ;;  %v3450_v51 = vld [vmem:[#allocation11 + $0xb0] ss:$12 sps:$4 sm:$0xff]  }
 0x38e   :  { %v3492_v44 = vpop.eup %3491 }
 0x38f   :  { %v1264_v47 = vmul.f32 %v3492_v44, %v1242_v41  ;;  %v3494_v56 = vpop.eup %3493 }
 0x390   :  { %v1269_v60 = vsub.f32 1.0, %v3494_v56  ;;  %v1271_v63 = vmul.f32 %v3494_v56, %v3993_v21  ;;  %v4068_v21 = vld [vmem:[#allocation11 + $0x64] ss:$12 sps:$4 sm:$0xff]  }
 0x391   :  { %v1267_v53 = vadd.f32 %v1265_v50, %v1264_v47 }
 0x393   :  { %3495 = vtanh.f32 %v1267_v53  ;;  %v1553_v53 = vrot.slane %v1275_v58, 2 }
 0x39d   :  { %v3496_v61 = vpop.eup %3495 }
 0x39e   :  { %v1270_v62 = vmul.f32 %v3496_v61, %v1269_v60 }
 0x3a0   :  { %v4031_v0 = vadd.f32 %v1271_v63, %v1270_v62 }
 0x3a2   :  { %1273 = vst [vmem:[#allocation12 + $0x2] sm:$0x1] %v4031_v0  ;;  %v1276_v1 = vpack.c.bf16 %v4031_v0, %v4031_v0 }
 0x3a4   :  { %1487 = vmatmul.mubr.bf16.vlgmr.msra.gmra.mrb[16].mxu0 %v1276_v1  ;;  %3227 = vmatmul.mubr.bf16.vlgmr.msra.gmra.mrb[16].mxu1 %v1276_v1 }
 0x3a5   :  { %1774 = vmatprep.mubr.bf16.mxu0 %v3686_v3  ;;  %3246 = vmatprep.mubr.msk.bf16.mxu1 %vm3687_vm0, %v3685_v2 }
 0x3a6   :  { %1743 = vmatpush1.bf16.msra.mxu0 %v4041_v5  ;;  %3231 = vmatpush3.bf16.msra.mxu1 %v3414_v6 }
 0x3a7   :  { %3232 = vmatprep.subr.bf16.mxu1 %v3685_v2  ;;  %1744 = vmatprep.subr.bf16.mxu0 %v4045_v7 }
 0x3aa   :  { %1745 = vmatpush1.bf16.msra.mxu0 %v4048_v8  ;;  %3233 = vmatpush3.bf16.msra.mxu1 %v3418_v9 }
 0x3ab   :  { %3234 = vmatprep.subr.bf16.mxu1 %v3685_v2  ;;  %1746 = vmatprep.subr.bf16.mxu0 %v4052_v12 }
 0x3ae   :  { %1747 = vmatpush1.bf16.msra.mxu0 %v4055_v14  ;;  %3235 = vmatpush3.bf16.msra.mxu1 %v3422_v15  ;;  %v3444_v15 = vld [vmem:[#allocation11 + $0x20] ss:$12 sps:$4 sm:$0xff]  }
 0x3af   :  { %3236 = vmatprep.subr.bf16.mxu1 %v3685_v2  ;;  %1748 = vmatprep.subr.bf16.mxu0 %v4059_v16 }
 0x3b2   :  { %1749 = vmatpush1.bf16.msra.mxu0 %v4062_v17  ;;  %3237 = vmatpush3.bf16.msra.mxu1 %v3426_v18  ;;  %v3445_v18 = vld [vmem:[#allocation11 + $0x38] ss:$12 sps:$4 sm:$0xff]  }
 0x3b3   :  { %3238 = vmatprep.subr.bf16.mxu1 %v3685_v2  ;;  %1750 = vmatprep.subr.bf16.mxu0 %v4068_v21 }
 0x3b6   :  { %1751 = vmatpush1.bf16.msra.mxu0 %v4066_v19  ;;  %3239 = vmatpush3.bf16.msra.mxu1 %v3430_v59  ;;  %v3446_v59 = vld [vmem:[#allocation11 + $0x50] ss:$12 sps:$4 sm:$0xff]  }
 0x3b7   :  { %1752 = vmatprep.subr.bf16.mxu0 %v4071_v35  ;;  %3240 = vmatprep.subr.bf16.mxu1 %v3685_v2 }
 0x3ba   :  { %1753 = vmatpush1.bf16.msra.mxu0 %v4075_v37  ;;  %3241 = vmatpush3.bf16.msra.mxu1 %v3434_v40  ;;  %v3447_v40 = vld [vmem:[#allocation11 + $0x68] ss:$12 sps:$4 sm:$0xff]  }
 0x3bb   :  { %1754 = vmatprep.subr.bf16.mxu0 %v4079_v42  ;;  %3242 = vmatprep.subr.bf16.mxu1 %v3685_v2 }
 0x3be   :  { %1755 = vmatpush1.bf16.msra.mxu0 %v4082_v43  ;;  %3243 = vmatpush3.bf16.msra.mxu1 %v3438_v45  ;;  %v3448_v45 = vld [vmem:[#allocation11 + $0x80] ss:$12 sps:$4 sm:$0xff]  }
 0x3bf   :  { %1756 = vmatprep.subr.bf16.mxu0 %v4086_v46  ;;  %3244 = vmatprep.subr.bf16.mxu1 %v3685_v2 }
 0x3c2   :  { %1757 = vmatpush1.bf16.msra.mxu0 %v4089_v48  ;;  %3245 = vmatpush3.bf16.msra.mxu1 %v3442_v49  ;;  %v3449_v49 = vld [vmem:[#allocation11 + $0x98] ss:$12 sps:$4 sm:$0xff]  }
 0x3c3   :  { %2030 = vmatprep.subr.bf16.mxu0 %v4039_v4  ;;  %3250 = vmatprep.subr.bf16.mxu1 %v3685_v2 }
 0x477   :  { %v1488_v55 = vpop.f32.mrb[16].mxu0  ;;  %v1529_v57 = vpop.f32.mrb[16].mxu1 }
 0x478   :  { %v1489_v20 = vadd.f32 %v1488_v55, %v1442_v52  ;;  %v1490_v22 = vpop.f32.mrb[17].mxu0  ;;  %v3228_v23 = vpop.f32.mrb[17].mxu1  ;;  %v1530_v44 = vadd.f32 %v1529_v57, %v1450_v39  ;;  %v1597_v52 = vld [vmem:[%s4261_s5] sm:$0x7] }
 0x479   :  { %v1491_v24 = vadd.f32 %v1490_v22, %v1446_v54  ;;  %v1492_v25 = vpop.f32.mrb[18].mxu0  ;;  %v1532_v26 = vpop.f32.mrb[18].mxu1  ;;  %v1730_v54 = vrot.slane %v1597_v52, %v3935_v10  ;;  %v1734_v55 = vrot.slane %v1597_v52, %v3942_v13 }
 0x47a   :  { %v1535_v28 = vadd.f32 %v1489_v20, %v1275_v58  ;;  %v1493_v27 = vpop.f32.mrb[19].mxu0  ;;  %v3229_v29 = vpop.f32.mrb[19].mxu1  ;;  %v1563_v20 = vld [vmem:[#allocation3 + $0x4] ss:$8 sm:$0x7] }
 0x47b   :  { %v1545_v32 = vadd.f32 %v1543_v30, %v1491_v24 }
 0x47c   :  { %v2927_v31 = vmul.f32 -1.442695, %v1535_v28 }
 0x47d   :  { %v2928_v33 = vmul.f32 -1.442695, %v1545_v32 }
 0x47e   :  { %3497 = vpow2.f32 %v2927_v31  ;;  %v1831_v31 = vrot.slane %v1563_v20, 1 }
 0x47f   :  { %3499 = vpow2.f32 %v2928_v33 }
 0x488   :  { %v3498_v34 = vpop.eup %3497 }
 0x489   :  { %v1539_v36 = vadd.f32 1.0, %v3498_v34  ;;  %v3500_v38 = vpop.eup %3499 }
 0x48a   :  { %v1549_v41 = vadd.f32 1.0, %v3500_v38 }
 0x48b   :  { %3501 = vrcp.f32 %v1539_v36 }
 0x48c   :  { %3503 = vrcp.f32 %v1549_v41  ;;  %v1738_v41 = vrot.slane %v1597_v52, %v3937_v11  ;;  %v1885_v52 = vld [vmem:[%s4261_s5] sm:$0x7] }
 0x495   :  { %v3502_v47 = vpop.eup %3501 }
 0x496   :  { %v1552_v50 = vmul.f32 %v3502_v47, %v1530_v44  ;;  %v3504_v60 = vpop.eup %3503 }
 0x497   :  { %v1557_v61 = vsub.f32 1.0, %v3504_v60  ;;  %v1559_v1 = vmul.f32 %v3504_v60, %v4031_v0  ;;  %v3443_v0 = vld [vmem:[#allocation11 + $0x8] ss:$12 sps:$4 sm:$0xff]  }
 0x498   :  { %v1555_v56 = vadd.f32 %v1553_v53, %v1552_v50 }
 0x49a   :  { %3505 = vtanh.f32 %v1555_v56  ;;  %v1841_v56 = vrot.slane %v1563_v20, 2 }
 0x4a4   :  { %v3506_v62 = vpop.eup %3505 }
 0x4a5   :  { %v1558_v63 = vmul.f32 %v3506_v62, %v1557_v61 }
 0x4a7   :  { %v4103_v6 = vadd.f32 %v1559_v1, %v1558_v63 }
 0x4a9   :  { %1561 = vst [vmem:[#allocation12 + $0x3] sm:$0x1] %v4103_v6  ;;  %v1564_v9 = vpack.c.bf16 %v4103_v6, %v4103_v6 }
 0x4ab   :  { %1775 = vmatmul.mubr.bf16.vlgmr.msra.gmra.mrb[20].mxu0 %v1564_v9  ;;  %3247 = vmatmul.mubr.bf16.vlgmr.msra.gmra.mrb[20].mxu1 %v1564_v9 }
 0x4ac   :  { %2031 = vmatpush1.bf16.msra.mxu0 %v4041_v5  ;;  %2062 = vmatprep.mubr.bf16.mxu0 %v3686_v3 }
 0x4ad   :  { %2032 = vmatprep.subr.bf16.mxu0 %v4045_v7  ;;  %3266 = vmatprep.mubr.msk.bf16.mxu1 %vm3687_vm0, %v3685_v2 }
 0x4ae   :  { %3251 = vmatpush3.bf16.msra.mxu1 %v3443_v0 }
 0x4af   :  { %3252 = vmatprep.subr.bf16.mxu1 %v3685_v2 }
 0x4b0   :  { %2033 = vmatpush1.bf16.msra.mxu0 %v4048_v8 }
 0x4b1   :  { %2034 = vmatprep.subr.bf16.mxu0 %v4052_v12 }
 0x4b2   :  { %3253 = vmatpush3.bf16.msra.mxu1 %v3444_v15 }
 0x4b3   :  { %3254 = vmatprep.subr.bf16.mxu1 %v3685_v2 }
 0x4b4   :  { %2035 = vmatpush1.bf16.msra.mxu0 %v4055_v14 }
 0x4b5   :  { %2036 = vmatprep.subr.bf16.mxu0 %v4059_v16 }
 0x4b6   :  { %3255 = vmatpush3.bf16.msra.mxu1 %v3445_v18  ;;  %v3452_v18 = vld [vmem:[#allocation11 + $0x20] ss:$12 sps:$4 sm:$0xff]  }
 0x4b7   :  { %3256 = vmatprep.subr.bf16.mxu1 %v3685_v2 }
 0x4b8   :  { %2037 = vmatpush1.bf16.msra.mxu0 %v4062_v17 }
 0x4b9   :  { %2038 = vmatprep.subr.bf16.mxu0 %v4068_v21 }
 0x4ba   :  { %3257 = vmatpush3.bf16.msra.mxu1 %v3446_v59  ;;  %v3453_v59 = vld [vmem:[#allocation11 + $0x38] ss:$12 sps:$4 sm:$0xff]  }
 0x4bb   :  { %3258 = vmatprep.subr.bf16.mxu1 %v3685_v2 }
 0x4bc   :  { %2039 = vmatpush1.bf16.msra.mxu0 %v4066_v19 }
 0x4bd   :  { %2040 = vmatprep.subr.bf16.mxu0 %v4071_v35 }
 0x4be   :  { %3259 = vmatpush3.bf16.msra.mxu1 %v3447_v40  ;;  %v3454_v40 = vld [vmem:[#allocation11 + $0x50] ss:$12 sps:$4 sm:$0xff]  }
 0x4bf   :  { %3260 = vmatprep.subr.bf16.mxu1 %v3685_v2 }
 0x4c0   :  { %2041 = vmatpush1.bf16.msra.mxu0 %v4075_v37 }
 0x4c1   :  { %2042 = vmatprep.subr.bf16.mxu0 %v4079_v42 }
 0x4c2   :  { %3261 = vmatpush3.bf16.msra.mxu1 %v3448_v45  ;;  %v3455_v45 = vld [vmem:[#allocation11 + $0x68] ss:$12 sps:$4 sm:$0xff]  }
 0x4c3   :  { %3262 = vmatprep.subr.bf16.mxu1 %v3685_v2 }
 0x4c4   :  { %2043 = vmatpush1.bf16.msra.mxu0 %v4082_v43 }
 0x4c5   :  { %2044 = vmatprep.subr.bf16.mxu0 %v4086_v46 }
 0x4c6   :  { %3263 = vmatpush3.bf16.msra.mxu1 %v3449_v49  ;;  %v3456_v49 = vld [vmem:[#allocation11 + $0x80] ss:$12 sps:$4 sm:$0xff]  }
 0x4c7   :  { %3264 = vmatprep.subr.bf16.mxu1 %v3685_v2 }
 0x4c8   :  { %2045 = vmatpush1.bf16.msra.mxu0 %v4089_v48 }
 0x4c9   :  { %2318 = vmatprep.subr.bf16.mxu0 %v4039_v4 }
 0x4ca   :  { %3265 = vmatpush3.bf16.msra.mxu1 %v3450_v51  ;;  %v3458_v51 = vld [vmem:[#allocation11 + $0xb0] ss:$12 sps:$4 sm:$0xff]  }
 0x4cb   :  { %3270 = vmatprep.subr.bf16.mxu1 %v3685_v2 }
 0x57e   :  { %v1776_v57 = vpop.f32.mrb[20].mxu0  ;;  %v1817_v58 = vpop.f32.mrb[20].mxu1 }
 0x57f   :  { %v1777_v22 = vadd.f32 %v1776_v57, %v1730_v54  ;;  %v1778_v23 = vpop.f32.mrb[21].mxu0  ;;  %v3248_v24 = vpop.f32.mrb[21].mxu1  ;;  %v1818_v47 = vadd.f32 %v1817_v58, %v1738_v41  ;;  %v2018_v54 = vrot.slane %v1885_v52, %v3935_v10  ;;  %v2026_v41 = vrot.slane %v1885_v52, %v3937_v11 }
 0x580   :  { %v1779_v25 = vadd.f32 %v1778_v23, %v1734_v55  ;;  %v1780_v26 = vpop.f32.mrb[22].mxu0  ;;  %v1820_v28 = vpop.f32.mrb[22].mxu1  ;;  %v2022_v55 = vrot.slane %v1885_v52, %v3942_v13 }
 0x581   :  { %v1823_v27 = vadd.f32 %v1777_v22, %v1563_v20  ;;  %v1781_v29 = vpop.f32.mrb[23].mxu0  ;;  %v3249_v30 = vpop.f32.mrb[23].mxu1  ;;  %v1851_v20 = vld [vmem:[#allocation3 + $0x5] ss:$8 sm:$0x7] }
 0x582   :  { %v1833_v33 = vadd.f32 %v1831_v31, %v1779_v25  ;;  %v2119_v31 = vrot.slane %v1851_v20, 1 }
 0x583   :  { %v2953_v32 = vmul.f32 -1.442695, %v1823_v27 }
 0x584   :  { %v2954_v34 = vmul.f32 -1.442695, %v1833_v33 }
 0x585   :  { %3507 = vpow2.f32 %v2953_v32 }
 0x586   :  { %3509 = vpow2.f32 %v2954_v34 }
 0x58f   :  { %v3508_v36 = vpop.eup %3507 }
 0x590   :  { %v1827_v38 = vadd.f32 1.0, %v3508_v36  ;;  %v3510_v39 = vpop.eup %3509 }
 0x591   :  { %v1837_v44 = vadd.f32 1.0, %v3510_v39 }
 0x592   :  { %3511 = vrcp.f32 %v1827_v38 }
 0x593   :  { %3513 = vrcp.f32 %v1837_v44 }
 0x59c   :  { %v3512_v50 = vpop.eup %3511 }
 0x59d   :  { %v1840_v53 = vmul.f32 %v3512_v50, %v1818_v47  ;;  %v3514_v61 = vpop.eup %3513 }
 0x59e   :  { %v1845_v62 = vsub.f32 1.0, %v3514_v61  ;;  %v1847_v9 = vmul.f32 %v3514_v61, %v4103_v6  ;;  %v3451_v6 = vld [vmem:[#allocation11 + $0x8] ss:$12 sps:$4 sm:$0xff]  }
 0x59f   :  { %v1843_v60 = vadd.f32 %v1841_v56, %v1840_v53  ;;  %v2129_v56 = vrot.slane %v1851_v20, 2 }
 0x5a1   :  { %3515 = vtanh.f32 %v1843_v60 }
 0x5ab   :  { %v3516_v63 = vpop.eup %3515 }
 0x5ac   :  { %v1846_v1 = vmul.f32 %v3516_v63, %v1845_v62 }
 0x5ae   :  { %v4142_v0 = vadd.f32 %v1847_v9, %v1846_v1 }
 0x5b0   :  { %1849 = vst [vmem:[#allocation12 + $0x4] sm:$0x1] %v4142_v0  ;;  %v1852_v15 = vpack.c.bf16 %v4142_v0, %v4142_v0 }
 0x5b2   :  { %2063 = vmatmul.mubr.bf16.vlgmr.msra.gmra.mrb[24].mxu0 %v1852_v15  ;;  %3267 = vmatmul.mubr.bf16.vlgmr.msra.gmra.mrb[24].mxu1 %v1852_v15 }
 0x5b3   :  { %2319 = vmatpush1.bf16.msra.mxu0 %v4041_v5  ;;  %2350 = vmatprep.mubr.bf16.mxu0 %v3686_v3 }
 0x5b4   :  { %2320 = vmatprep.subr.bf16.mxu0 %v4045_v7  ;;  %3286 = vmatprep.mubr.msk.bf16.mxu1 %vm3687_vm0, %v3685_v2 }
 0x5b5   :  { %3271 = vmatpush3.bf16.msra.mxu1 %v3451_v6 }
 0x5b6   :  { %3272 = vmatprep.subr.bf16.mxu1 %v3685_v2 }
 0x5b7   :  { %2321 = vmatpush1.bf16.msra.mxu0 %v4048_v8 }
 0x5b8   :  { %2322 = vmatprep.subr.bf16.mxu0 %v4052_v12 }
 0x5b9   :  { %3273 = vmatpush3.bf16.msra.mxu1 %v3452_v18 }
 0x5ba   :  { %3274 = vmatprep.subr.bf16.mxu1 %v3685_v2 }
 0x5bb   :  { %2323 = vmatpush1.bf16.msra.mxu0 %v4055_v14 }
 0x5bc   :  { %2324 = vmatprep.subr.bf16.mxu0 %v4059_v16 }
 0x5bd   :  { %3275 = vmatpush3.bf16.msra.mxu1 %v3453_v59 }
 0x5be   :  { %3276 = vmatprep.subr.bf16.mxu1 %v3685_v2 }
 0x5bf   :  { %2325 = vmatpush1.bf16.msra.mxu0 %v4062_v17 }
 0x5c0   :  { %2326 = vmatprep.subr.bf16.mxu0 %v4068_v21 }
 0x5c1   :  { %3277 = vmatpush3.bf16.msra.mxu1 %v3454_v40 }
 0x5c2   :  { %3278 = vmatprep.subr.bf16.mxu1 %v3685_v2 }
 0x5c3   :  { %2327 = vmatpush1.bf16.msra.mxu0 %v4066_v19 }
 0x5c4   :  { %2328 = vmatprep.subr.bf16.mxu0 %v4071_v35 }
 0x5c5   :  { %3279 = vmatpush3.bf16.msra.mxu1 %v3455_v45 }
 0x5c6   :  { %3280 = vmatprep.subr.bf16.mxu1 %v3685_v2 }
 0x5c7   :  { %2329 = vmatpush1.bf16.msra.mxu0 %v4075_v37 }
 0x5c8   :  { %2330 = vmatprep.subr.bf16.mxu0 %v4079_v42 }
 0x5c9   :  { %3281 = vmatpush3.bf16.msra.mxu1 %v3456_v49 }
 0x5ca   :  { %3282 = vmatprep.subr.bf16.mxu1 %v3685_v2 }
 0x5cb   :  { %2331 = vmatpush1.bf16.msra.mxu0 %v4082_v43 }
 0x5cc   :  { %2332 = vmatprep.subr.bf16.mxu0 %v4086_v46 }
 0x5cf   :  { %2333 = vmatpush1.bf16.msra.mxu0 %v4089_v48 }
 0x5d0   :  { %2606 = vmatprep.subr.bf16.mxu0 %v4039_v4  ;;  %v3457_v4 = vld [vmem:[#allocation11 + $0x98] ss:$12 sps:$4 sm:$0xff]  }
 0x5d1   :  { %3283 = vmatpush3.bf16.msra.mxu1 %v3457_v4 }
 0x5d2   :  { %3284 = vmatprep.subr.bf16.mxu1 %v3685_v2 }
 0x5d5   :  { %3285 = vmatpush3.bf16.msra.mxu1 %v3458_v51 }
 0x5d6   :  { %3290 = vmatprep.subr.bf16.mxu1 %v3685_v2 }
 0x685   :  { %v2064_v57 = vpop.f32.mrb[24].mxu0  ;;  %v2105_v58 = vpop.f32.mrb[24].mxu1 }
 0x686   :  { %v2065_v22 = vadd.f32 %v2064_v57, %v2018_v54  ;;  %v2066_v23 = vpop.f32.mrb[25].mxu0  ;;  %v3268_v24 = vpop.f32.mrb[25].mxu1  ;;  %v2106_v47 = vadd.f32 %v2105_v58, %v2026_v41 }
 0x687   :  { %v2067_v25 = vadd.f32 %v2066_v23, %v2022_v55  ;;  %v2068_v26 = vpop.f32.mrb[26].mxu0  ;;  %v2108_v28 = vpop.f32.mrb[26].mxu1 }
 0x688   :  { %v2111_v27 = vadd.f32 %v2065_v22, %v1851_v20  ;;  %v2069_v29 = vpop.f32.mrb[27].mxu0  ;;  %v3269_v30 = vpop.f32.mrb[27].mxu1 }
 0x689   :  { %v2121_v33 = vadd.f32 %v2119_v31, %v2067_v25 }
 0x68a   :  { %v2979_v32 = vmul.f32 -1.442695, %v2111_v27 }
 0x68b   :  { %v2980_v34 = vmul.f32 -1.442695, %v2121_v33 }
 0x68c   :  { %3517 = vpow2.f32 %v2979_v32 }
 0x68d   :  { %3519 = vpow2.f32 %v2980_v34 }
 0x696   :  { %v3518_v36 = vpop.eup %3517 }
 0x697   :  { %v2115_v38 = vadd.f32 1.0, %v3518_v36  ;;  %v3520_v39 = vpop.eup %3519  ;;  %v2461_v36 = vld [vmem:[%s4261_s5] sm:$0x7] }
 0x698   :  { %v2125_v44 = vadd.f32 1.0, %v3520_v39  ;;  %v2598_v39 = vrot.slane %v2461_v36, %v3942_v13 }
 0x699   :  { %3521 = vrcp.f32 %v2115_v38  ;;  %v2594_v38 = vrot.slane %v2461_v36, %v3935_v10 }
 0x69a   :  { %3523 = vrcp.f32 %v2125_v44 }
 0x6a3   :  { %v3522_v50 = vpop.eup %3521 }
 0x6a4   :  { %v2128_v53 = vmul.f32 %v3522_v50, %v2106_v47  ;;  %v3524_v61 = vpop.eup %3523  ;;  %v2427_v47 = vld [vmem:[#allocation3 + $0x7] ss:$8 sm:$0x7] }
 0x6a5   :  { %v2133_v62 = vsub.f32 1.0, %v3524_v61  ;;  %v2135_v9 = vmul.f32 %v3524_v61, %v4142_v0 }
 0x6a6   :  { %v2131_v60 = vadd.f32 %v2129_v56, %v2128_v53 }
 0x6a8   :  { %3525 = vtanh.f32 %v2131_v60 }
 0x6b2   :  { %v3526_v63 = vpop.eup %3525 }
 0x6b3   :  { %v2134_v1 = vmul.f32 %v3526_v63, %v2133_v62 }
 0x6b5   :  { %v4181_v15 = vadd.f32 %v2135_v9, %v2134_v1 }
 0x6b7   :  { %2137 = vst [vmem:[#allocation12 + $0x5] sm:$0x1] %v4181_v15  ;;  %v2140_v6 = vpack.c.bf16 %v4181_v15, %v4181_v15 }
 0x6b9   :  { %2351 = vmatmul.mubr.bf16.vlgmr.msra.gmra.mrb[28].mxu0 %v2140_v6  ;;  %3287 = vmatmul.mubr.bf16.vlgmr.msra.gmra.mrb[28].mxu1 %v2140_v6 }
 0x6ba   :  { %2607 = vmatpush1.bf16.msra.mxu0 %v4041_v5  ;;  %2638 = vmatprep.mubr.bf16.mxu0 %v3686_v3  ;;  %v3459_v3 = vld [vmem:[#allocation11 + $0x8] ss:$12 sps:$4 sm:$0xff]   ;;  %v3460_v5 = vld [vmem:[#allocation11 + $0x20] ss:$12 sps:$4 sm:$0xff]  }
 0x6bb   :  { %2608 = vmatprep.subr.bf16.mxu0 %v4045_v7  ;;  %3306 = vmatprep.mubr.msk.bf16.mxu1 %vm3687_vm0, %v3685_v2  ;;  %v3461_v7 = vld [vmem:[#allocation11 + $0x38] ss:$12 sps:$4 sm:$0xff]  }
 0x6bc   :  { %3291 = vmatpush3.bf16.msra.mxu1 %v3459_v3 }
 0x6bd   :  { %3292 = vmatprep.subr.bf16.mxu1 %v3685_v2 }
 0x6be   :  { %2609 = vmatpush1.bf16.msra.mxu0 %v4048_v8  ;;  %v3462_v8 = vld [vmem:[#allocation11 + $0x50] ss:$12 sps:$4 sm:$0xff]  }
 0x6bf   :  { %2610 = vmatprep.subr.bf16.mxu0 %v4052_v12  ;;  %v3463_v12 = vld [vmem:[#allocation11 + $0x68] ss:$12 sps:$4 sm:$0xff]  }
 0x6c0   :  { %3293 = vmatpush3.bf16.msra.mxu1 %v3460_v5 }
 0x6c1   :  { %3294 = vmatprep.subr.bf16.mxu1 %v3685_v2 }
 0x6c2   :  { %2611 = vmatpush1.bf16.msra.mxu0 %v4055_v14  ;;  %v3464_v14 = vld [vmem:[#allocation11 + $0x80] ss:$12 sps:$4 sm:$0xff]  }
 0x6c3   :  { %2612 = vmatprep.subr.bf16.mxu0 %v4059_v16  ;;  %v3465_v16 = vld [vmem:[#allocation11 + $0x98] ss:$12 sps:$4 sm:$0xff]  }
 0x6c4   :  { %3295 = vmatpush3.bf16.msra.mxu1 %v3461_v7 }
 0x6c5   :  { %3296 = vmatprep.subr.bf16.mxu1 %v3685_v2 }
 0x6c6   :  { %2613 = vmatpush1.bf16.msra.mxu0 %v4062_v17  ;;  %v3466_v17 = vld [vmem:[#allocation11 + $0xb0] ss:$12 sps:$4 sm:$0xff]  }
 0x6c7   :  { %2614 = vmatprep.subr.bf16.mxu0 %v4068_v21 }
 0x6c8   :  { %3297 = vmatpush3.bf16.msra.mxu1 %v3462_v8  ;;  %v2602_v8 = vrot.slane %v2461_v36, %v3937_v11 }
 0x6c9   :  { %3298 = vmatprep.subr.bf16.mxu1 %v3685_v2 }
 0x6ca   :  { %2615 = vmatpush1.bf16.msra.mxu0 %v4066_v19  ;;  %v2173_v19 = vld [vmem:[%s4261_s5] sm:$0x7]  ;;  %s3688_s5 = smov [#allocation12]  }
 0x6cb   :  { %2616 = vmatprep.subr.bf16.mxu0 %v4071_v35  ;;  %v2306_v21 = vrot.slane %v2173_v19, %v3935_v10  ;;  %v2310_v35 = vrot.slane %v2173_v19, %v3942_v13  ;;  %v2314_v20 = vrot.slane %v2173_v19, %v3937_v11  ;;  %v2705_v19 = vrot.slane %v2427_v47, 2  ;;  %s2721_s0 = sshll.u32 %s3688_s5, 4  ;;  %s2722_s0 = int_to_ptr.vmem [resolvable:$true] %s2721_s0 }
 0x6cc   :  { %3299 = vmatpush3.bf16.msra.mxu1 %v3463_v12  ;;  %s3623_s20 = scalar_lea.vmem %s2722_s0, 128  ;;  %p3628_p2 = scmp.lt.s32.totalorder %s2722_s0, %s2722_s0 }
 0x6cd   :  { %3300 = vmatprep.subr.bf16.mxu1 %v3685_v2  ;;  %p3624_p1 = scmp.ne.s32.totalorder %s2722_s0, %s3623_s20  ;;  %p3629_p3 = scmp.lt.s32.totalorder %s3623_s20, %s3623_s20 }
 0x6ce   :  { %2617 = vmatpush1.bf16.msra.mxu0 %v4075_v37 }
 0x6cf   :  { %2618 = vmatprep.subr.bf16.mxu0 %v4079_v42  ;;  %p3630_p4 = por %p3629_p3, %p3628_p2 }
 0x6d0   :  { %3301 = vmatpush3.bf16.msra.mxu1 %v3464_v14 }
 0x6d1   :  { %3302 = vmatprep.subr.bf16.mxu1 %v3685_v2  ;;  %p3631_p5 = pnand %p3630_p4, %p3624_p1 }
 0x6d2   :  { %2619 = vmatpush1.bf16.msra.mxu0 %v4082_v43  ;;  %v2139_v43 = vld [vmem:[#allocation3 + $0x6] ss:$8 sm:$0x7] }
 0x6d3   :  { %2620 = vmatprep.subr.bf16.mxu0 %v4086_v46  ;;  %v2407_v4 = vrot.slane %v2139_v43, 1  ;;  %v2417_v26 = vrot.slane %v2139_v43, 2 }
 0x6d4   :  { %3303 = vmatpush3.bf16.msra.mxu1 %v3465_v16 }
 0x6d5   :  { %3304 = vmatprep.subr.bf16.mxu1 %v3685_v2 }
 0x6d6   :  { %2621 = vmatpush1.bf16.msra.mxu0 %v4089_v48 }
 0x6d8   :  { %3305 = vmatpush3.bf16.msra.mxu1 %v3466_v17 }
 0x78c   :  { %v2352_v37 = vpop.f32.mrb[28].mxu0  ;;  %v2393_v42 = vpop.f32.mrb[28].mxu1 }
 0x78d   :  { %v2353_v46 = vadd.f32 %v2352_v37, %v2306_v21  ;;  %v2354_v48 = vpop.f32.mrb[29].mxu0  ;;  %v3288_v0 = vpop.f32.mrb[29].mxu1  ;;  %v2394_v23 = vadd.f32 %v2393_v42, %v2314_v20 }
 0x78e   :  { %v2355_v18 = vadd.f32 %v2354_v48, %v2310_v35  ;;  %v2356_v59 = vpop.f32.mrb[30].mxu0  ;;  %v2396_v40 = vpop.f32.mrb[30].mxu1 }
 0x78f   :  { %v2399_v45 = vadd.f32 %v2353_v46, %v2139_v43  ;;  %v2357_v2 = vpop.f32.mrb[31].mxu0  ;;  %v3289_v49 = vpop.f32.mrb[31].mxu1 }
 0x790   :  { %v2409_v52 = vadd.f32 %v2407_v4, %v2355_v18 }
 0x791   :  { %v3005_v51 = vmul.f32 -1.442695, %v2399_v45 }
 0x792   :  { %v3006_v54 = vmul.f32 -1.442695, %v2409_v52 }
 0x793   :  { %3527 = vpow2.f32 %v3005_v51 }
 0x794   :  { %3529 = vpow2.f32 %v3006_v54 }
 0x79d   :  { %v3528_v55 = vpop.eup %3527 }
 0x79e   :  { %v2403_v57 = vadd.f32 1.0, %v3528_v55  ;;  %v3530_v58 = vpop.eup %3529 }
 0x79f   :  { %v2413_v22 = vadd.f32 1.0, %v3530_v58 }
 0x7a0   :  { %3531 = vrcp.f32 %v2403_v57 }
 0x7a1   :  { %3533 = vrcp.f32 %v2413_v22 }
 0x7aa   :  { %v3532_v24 = vpop.eup %3531 }
 0x7ab   :  { %v2416_v25 = vmul.f32 %v3532_v24, %v2394_v23  ;;  %v3534_v27 = vpop.eup %3533 }
 0x7ac   :  { %v2421_v29 = vsub.f32 1.0, %v3534_v27  ;;  %v2423_v32 = vmul.f32 %v3534_v27, %v4181_v15  ;;  %v2695_v15 = vrot.slane %v2427_v47, 1 }
 0x7ad   :  { %v2419_v28 = vadd.f32 %v2417_v26, %v2416_v25 }
 0x7af   :  { %3535 = vtanh.f32 %v2419_v28 }
 0x7b9   :  { %v3536_v30 = vpop.eup %3535 }
 0x7ba   :  { %v2422_v31 = vmul.f32 %v3536_v30, %v2421_v29 }
 0x7bc   :  { %v2424_v33 = vadd.f32 %v2423_v32, %v2422_v31 }
 0x7be   :  { %2425 = vst [vmem:[#allocation12 + $0x6] sm:$0x1] %v2424_v33  ;;  %v2428_v34 = vpack.c.bf16 %v2424_v33, %v2424_v33 }
 0x7c0   :  { %2639 = vmatmul.mubr.bf16.vlgmr.msra.gmra.mrb[32].mxu0 %v2428_v34  ;;  %3307 = vmatmul.mubr.bf16.vlgmr.msra.gmra.mrb[32].mxu1 %v2428_v34 }
 0x893   :  { %v2640_v41 = vpop.f32.mrb[32].mxu0  ;;  %v2681_v44 = vpop.f32.mrb[32].mxu1 }
 0x894   :  { %v2641_v50 = vadd.f32 %v2640_v41, %v2594_v38  ;;  %v2642_v53 = vpop.f32.mrb[33].mxu0  ;;  %v3308_v56 = vpop.f32.mrb[33].mxu1  ;;  %v2682_v14 = vadd.f32 %v2681_v44, %v2602_v8 }
 0x895   :  { %v2643_v60 = vadd.f32 %v2642_v53, %v2598_v39  ;;  %v2644_v61 = vpop.f32.mrb[34].mxu0  ;;  %v2684_v62 = vpop.f32.mrb[34].mxu1 }
 0x896   :  { %v2687_v63 = vadd.f32 %v2641_v50, %v2427_v47  ;;  %v2645_v1 = vpop.f32.mrb[35].mxu0  ;;  %v3309_v9 = vpop.f32.mrb[35].mxu1 }
 0x897   :  { %v2697_v3 = vadd.f32 %v2695_v15, %v2643_v60 }
 0x898   :  { %v3031_v6 = vmul.f32 -1.442695, %v2687_v63 }
 0x899   :  { %v3032_v5 = vmul.f32 -1.442695, %v2697_v3 }
 0x89a   :  { %3537 = vpow2.f32 %v3031_v6 }
 0x89b   :  { %3539 = vpow2.f32 %v3032_v5 }
 0x8a4   :  { %v3538_v10 = vpop.eup %3537 }
 0x8a5   :  { %v2691_v13 = vadd.f32 1.0, %v3538_v10  ;;  %v3540_v7 = vpop.eup %3539 }
 0x8a6   :  { %v2701_v12 = vadd.f32 1.0, %v3540_v7 }
 0x8a7   :  { %3541 = vrcp.f32 %v2691_v13 }
 0x8a8   :  { %3543 = vrcp.f32 %v2701_v12 }
 0x8b1   :  { %v3542_v16 = vpop.eup %3541 }
 0x8b2   :  { %v2704_v17 = vmul.f32 %v3542_v16, %v2682_v14  ;;  %v3544_v35 = vpop.eup %3543 }
 0x8b3   :  { %v2709_v37 = vsub.f32 1.0, %v3544_v35  ;;  %v2711_v46 = vmul.f32 %v3544_v35, %v2424_v33 }
 0x8b4   :  { %v2707_v21 = vadd.f32 %v2705_v19, %v2704_v17 }
 0x8b6   :  { %3545 = vtanh.f32 %v2707_v21 }
 0x8c0   :  { %v3546_v42 = vpop.eup %3545 }
 0x8c1   :  { %v2710_v43 = vmul.f32 %v3546_v42, %v2709_v37 }
 0x8c3   :  { %v2712_v48 = vadd.f32 %v2711_v46, %v2710_v43 }
 0x8c5   :  { %2713 = vst [vmem:[#allocation12 + $0x7] sm:$0x1] %v2712_v48  ;;  %2714 = vst [vmem:[#allocation13] sm:$0x1] %v2712_v48 }
 0x8c6   :  { %3634 = shalt.err (!%p3631_p5)
}
 0x8c7   :  { %s3635_s23 = scalar_lea.hbm %s4263_s7, 128 }
 0x8c8   :  { %p3636_p6 = scmp.ne.s32.totalorder %s4263_s7, %s3635_s23  ;;  %p3639_p7 = scmp.lt.u32.totalorder %s3635_s23, %s4263_s7 }
 0x8ca   :  { %p3641_p8 = pnand %p3639_p7, %p3636_p6 }
 0x8cc   :  { %3644 = shalt.err (!%p3641_p8)
}
 0x8cd   :  { %2724 = dma.vmem_to_hbm [thread:$0]  %s2722_s0, 128, %s4263_s7, [#allocation6]  }
 0x8ce   :  { %s3645_s29 = scalar_lea.vmem %s4224_s19, 16  ;;  %s3649_s2 = scalar_lea.vmem %s4224_s19, 32 }
 0x8cf   :  { %p3646_p9 = scmp.ne.s32.totalorder %s4224_s19, %s3645_s29  ;;  %p3650_p10 = scmp.lt.s32.totalorder %s4224_s19, %s4224_s19 }
 0x8d0   :  { %p3651_p11 = scmp.lt.s32.totalorder %s3649_s2, %s3645_s29 }
 0x8d2   :  { %p3652_p12 = por %p3651_p11, %p3650_p10 }
 0x8d4   :  { %p3653_p13 = pnand %p3652_p12, %p3646_p9 }
 0x8d6   :  { %3656 = shalt.err (!%p3653_p13)
}
 0x8d7   :  { %s3657_s28 = scalar_lea.hbm %s4264_s8, 16 }
 0x8d8   :  { %p3658_p0 = scmp.ne.s32.totalorder %s4264_s8, %s3657_s28  ;;  %p3661_p1 = scmp.lt.u32.totalorder %s3657_s28, %s4264_s8 }
 0x8da   :  { %p3663_p2 = pnand %p3661_p1, %p3658_p0 }
 0x8dc   :  { %3666 = shalt.err (!%p3663_p2)
}
 0x8dd   :  { %2734 = dma.vmem_to_hbm [thread:$0]  %s4224_s19, 16, %s4264_s8, [#allocation14]  }
 0x8de   :  { %3673 = dma.done.wait [#allocation6], 128  }
 0x8df   :  { %3674 = vsyncadd [#allocation6], 4294967168 }
 0x8e0   :  { %3675 = dma.done.wait [#allocation14], 16  }
 0x8e1   :  { %3676 = vsyncadd [#allocation14], 4294967280 }
 0x8e2   :  { %2741 = vsyncpa [#allocation5], 1 }
 0x8e3   :  { %2742 = vsyncpa [#allocation10], 1 }
 0x8e4   :  { %2743 = vsyncpa [#allocation6], 1 }
 0x8e5   :  { %2744 = vsyncpa [#allocation14], 1 }
 0x8e6   :  { %2745 = vsyncpa [#allocation7], 1 }

</bundles_post_ra>
